<compile_context>
chip_gen: v7x
topology: tpu7x:2x2x1
jax: 0.10.0
libtpu: 0.0.40
codegen_flags: <defaults>
</compile_context>

<pallas_src>
import functools

import jax
import jax.numpy as jnp
import numpy as np
from jax.experimental import pallas as pl
from jax.experimental.pallas import tpu as pltpu

_GELU_C = 0.7978845608028654  # sqrt(2/pi)


def _gelu_tanh(u):
    # TODO(synk): torch nn.GELU defaults to the exact erf form; tanh approx is
    # used here (guaranteed Mosaic lowering, EUP tanh). Max abs diff ~3e-3.
    return 0.5 * u * (1.0 + jnp.tanh(_GELU_C * (u + 0.044715 * u * u * u)))


def transformer_block_kernel(
        x_ref,                                    # (1, N, C) f32, full sequence
        mix_ref,                                  # (H, H) f32 in SMEM (scale folded)
        ln1_g_ref, ln1_b_ref,                     # norm1
        wq_h_ref, wk_h_ref, wv_h_ref,             # (H, C, hd) per-head qkv weights
        wp_h_ref, proj_b_ref,                     # (H, hd, C), (1, C)
        ln2_g_ref, ln2_b_ref,                     # norm2
        fc1_w_ref, fc1_b_ref, fc2_w_ref, fc2_b_ref,   # MLP
        o_ref,                                    # (1, TQ, C) f32
        h_full_s,                                 # (N, C)     cdt  scratch: LN1(x)
        k_h_s, v_h_s,                             # (H, N, hd) cdt  scratch: K, V
        logits_s,                                 # (H, TQ, N) f32  scratch: logits
        *, num_heads, tq, compute_dtype):
    f32 = jnp.float32
    cdt = compute_dtype
    H = num_heads
    c = x_ref.shape[2]

    def layernorm(v, g, b):
        mu = jnp.mean(v, axis=-1, keepdims=True)
        d = v - mu
        var = jnp.mean(d * d, axis=-1, keepdims=True)
        return d * jax.lax.rsqrt(var + 1e-5) * g + b

    def mm(a, b):            # a @ b on the MXU, f32 accumulation, no re-casts
        return jax.lax.dot_general(a, b, (((1,), (0,)), ((), ())),
                                   preferred_element_type=f32)

    def mm_nt(a, b):         # a @ b.T (contract the last dim of both operands)
        return jax.lax.dot_general(a, b, (((1,), (1,)), ((), ())),
                                   preferred_element_type=f32)

    qt = pl.program_id(1)
    unroll = H <= 4

    # ---- Per-batch cache (only at qt == 0): LN1(x_full), K_h, V_h are shared
    #      by every query tile; recomputing them per tile is nq-fold waste.
    @pl.when(qt == 0)
    def _():
        h_full = layernorm(x_ref[0], ln1_g_ref[...], ln1_b_ref[...]).astype(cdt)
        h_full_s[...] = h_full

        def kv_body(i, carry):
            k_h_s[i] = mm(h_full, wk_h_ref[i]).astype(cdt)
            v_h_s[i] = mm(h_full, wv_h_ref[i]).astype(cdt)
            return carry
        jax.lax.fori_loop(0, H, kv_body, 0, unroll=unroll)

    q_start = pl.multiple_of(qt * tq, tq)
    x_q = x_ref[0, pl.ds(q_start, tq), :]             # (TQ, C) f32 residual input
    h_q = h_full_s[pl.ds(q_start, tq), :]             # (TQ, C) cdt cached LN1 rows

    # ---- Phase 1: pre-mix per-head logits (hd-deep QK^T) into the VMEM stack.
    def logits_body(i, carry):
        q_i = mm(h_q, wq_h_ref[i]).astype(cdt)        # (TQ, hd)
        logits_s[i] = mm_nt(q_i, k_h_s[i])            # (TQ, N) f32, unscaled
        return carry
    jax.lax.fori_loop(0, H, logits_body, 0, unroll=unroll)

    # ---- Phase 2: CIM head mix (VPU weighted sums, scale folded into mix),
    #      softmax, P @ V_i, per-head output-projection accumulation.
    def head_body(i, y):
        mixed = mix_ref[i, 0] * logits_s[0]
        for j in range(1, H):                          # static inner sum over heads
            mixed = mixed + mix_ref[i, j] * logits_s[j]
        m = jnp.max(mixed, axis=-1, keepdims=True)
        e = jnp.exp(mixed - m)
        l = jnp.sum(e, axis=-1, keepdims=True)
        p = (e * pl.reciprocal(l, approx=True)).astype(cdt)   # EUP, not VPU divide
        o_i = mm(p, v_h_s[i]).astype(cdt)              # (TQ, hd)
        # TODO(synk): for hd % 128 == 0, accumulate o_i into a (TQ, C) buffer and
        #             run ONE (TQ,C)@(C,C) out-projection instead (review #4).
        return y + mm(o_i, wp_h_ref[i])                # (TQ, C) f32
    y = jax.lax.fori_loop(0, H, head_body,
                          jnp.zeros((tq, c), dtype=f32), unroll=unroll)

    x1 = x_q + y + proj_b_ref[...]                     # attention residual (f32)

    h2 = layernorm(x1, ln2_g_ref[...], ln2_b_ref[...]).astype(cdt)
    u = mm(h2, fc1_w_ref[...]) + fc1_b_ref[...]
    u = _gelu_tanh(u)                                  # f32 EUP tanh
    y2 = mm(u.astype(cdt), fc2_w_ref[...]) + fc2_b_ref[...]
    o_ref[0] = (x1 + y2).astype(o_ref.dtype)           # MLP residual


def _generation_defaults():
    """(vmem_limit_bytes, max query tile) per TPU generation."""
    try:
        vmem_cap = pltpu.get_tpu_info().vmem_capacity_bytes
    except Exception:
        return 64 * 1024 * 1024, 128                   # conservative fallback
    if vmem_cap <= 64 * 1024 * 1024:                   # v7x-class: 64 MiB per TC
        return 48 * 1024 * 1024, 128
    return 96 * 1024 * 1024, 256                       # v5e / v6e: 128 MiB per TC


def transformer_block_pallas(x, p, num_heads, *, tq=None,
                             compute_dtype=jnp.bfloat16):
    B, N, C = x.shape
    H = num_heads
    hd = C // H
    scale = hd ** (-0.5)
    Dh = p['w1'].shape[1]
    cdt = compute_dtype

    vmem_limit, tq_max = _generation_defaults()
    if tq is None:
        tq = N if N <= tq_max else tq_max              # query tile, multiple of 8
    assert N % tq == 0 and tq % 8 == 0
    nq = N // tq

    # ---- host-side weight preparation: per-head LEADING-axis layouts so the
    #      kernel never slices the lane axis; matmul weights pre-cast to cdt.
    qkv_w = p['qkv_w']                                            # (C, 3C), y = x @ W
    wq_h = qkv_w[:, :C].reshape(C, H, hd).transpose(1, 0, 2).astype(cdt)       # (H,C,hd)
    wk_h = qkv_w[:, C:2 * C].reshape(C, H, hd).transpose(1, 0, 2).astype(cdt)  # (H,C,hd)
    wv_h = qkv_w[:, 2 * C:].reshape(C, H, hd).transpose(1, 0, 2).astype(cdt)   # (H,C,hd)
    wp_h = p['proj_w'].reshape(H, hd, C).astype(cdt)                           # (H,hd,C)
    fc1_w = p['w1'].astype(cdt)
    fc2_w = p['w2'].astype(cdt)
    # CIM head-interaction matrix with the 1/sqrt(hd) scale folded in; applied
    # to the raw per-head logits as VPU weighted sums inside the kernel.
    mix_scaled = (p['mix'] * scale).astype(jnp.float32)                        # (H, H)

    kernel = functools.partial(transformer_block_kernel,
                               num_heads=H, tq=tq, compute_dtype=cdt)
    full2 = lambda b, qt: (0, 0)
    full3 = lambda b, qt: (0, 0, 0)
    # TODO(synk): weight blocks are grid-invariant; pipeline_mode=pl.Buffered(1)
    #             would halve their VMEM residency where supported (review #6).
    return pl.pallas_call(
        kernel,
        out_shape=jax.ShapeDtypeStruct((B, N, C), jnp.float32),
        grid=(B, nq),
        in_specs=[
            pl.BlockSpec((1, N, C), lambda b, qt: (b, 0, 0)),     # x (full seq)
            pl.BlockSpec(memory_space=pltpu.MemorySpace.SMEM),    # CIM mix*scale
            pl.BlockSpec((1, C), full2),                          # ln1 gamma
            pl.BlockSpec((1, C), full2),                          # ln1 beta
            pl.BlockSpec((H, C, hd), full3),                      # Wq per head
            pl.BlockSpec((H, C, hd), full3),                      # Wk per head
            pl.BlockSpec((H, C, hd), full3),                      # Wv per head
            pl.BlockSpec((H, hd, C), full3),                      # proj W per head
            pl.BlockSpec((1, C), full2),                          # proj bias
            pl.BlockSpec((1, C), full2),                          # ln2 gamma
            pl.BlockSpec((1, C), full2),                          # ln2 beta
            pl.BlockSpec((C, Dh), full2),                         # fc1 W
            pl.BlockSpec((1, Dh), full2),                         # fc1 b
            pl.BlockSpec((Dh, C), full2),                         # fc2 W
            pl.BlockSpec((1, C), full2),                          # fc2 b
        ],
        out_specs=pl.BlockSpec((1, tq, C), lambda b, qt: (b, qt, 0)),
        scratch_shapes=[
            pltpu.VMEM((N, C), cdt),                  # cached LN1(x_full)
            pltpu.VMEM((H, N, hd), cdt),              # cached K per head
            pltpu.VMEM((H, N, hd), cdt),              # cached V per head
            pltpu.VMEM((H, tq, N), jnp.float32),      # pre-mix logit stack
        ],
        compiler_params=pltpu.CompilerParams(
            # qt must be "arbitrary": the qt==0 guard fills the per-batch
            # LN/K/V cache that later query tiles read; only the batch axis is
            # core-parallel so the cache init holds per core.
            dimension_semantics=("parallel", "arbitrary"),
            vmem_limit_bytes=vmem_limit),
    )(x, mix_scaled, p['ln1_g'], p['ln1_b'], wq_h, wk_h, wv_h, wp_h,
      p['proj_b'], p['ln2_g'], p['ln2_b'], fc1_w, p['b1'], fc2_w, p['b2'])


def transformer_block_ref(x, p, num_heads):
    """Pure-JAX reference reproducing the PyTorch TransformerBlock forward."""
    B, N, C = x.shape
    H = num_heads
    hd = C // H
    scale = hd ** (-0.5)

    def ln(v, g, b):
        mu = v.mean(-1, keepdims=True)
        var = ((v - mu) ** 2).mean(-1, keepdims=True)
        return (v - mu) / jnp.sqrt(var + 1e-5) * g + b

    h = ln(x, p['ln1_g'], p['ln1_b'])
    qkv = (h @ p['qkv_w']).reshape(B, N, 3, H, hd).transpose(2, 0, 3, 1, 4)
    q, k, v = qkv[0], qkv[1], qkv[2]                       # (B, H, N, hd)
    attn = jnp.einsum('bhnd,bhmd->bhnm', q, k) * scale
    attn = jnp.einsum('ij,bjnm->binm', p['mix'], attn)     # CIM head interaction
    attn = jax.nn.softmax(attn, axis=-1)
    o = jnp.einsum('bhnm,bhmd->bhnd', attn, v)
    o = o.transpose(0, 2, 1, 3).reshape(B, N, C)
    x1 = x + o @ p['proj_w'] + p['proj_b'].reshape(1, 1, C)
    h2 = ln(x1, p['ln2_g'], p['ln2_b'])
    u = h2 @ p['w1'] + p['b1'].reshape(1, 1, -1)
    u = _gelu_tanh(u)
    return x1 + u @ p['w2'] + p['b2'].reshape(1, 1, C)


if __name__ == "__main__":
    B, N, C, H = 2, 16, 32, 4          # small shapes; C divisible by H
    Dh = int(C * 4.0)                  # mlp_ratio = 4.0

    key = jax.random.PRNGKey(0)
    ks = jax.random.split(key, 14)
    x = jax.random.normal(ks[0], (B, N, C), dtype=jnp.float32)

    # Linear weights stored pre-transposed: y = x @ W (+ b)
    qkv_w = jax.random.normal(ks[1], (C, 3 * C), jnp.float32) * (C ** -0.5)
    proj_w = jax.random.normal(ks[2], (C, C), jnp.float32) * (C ** -0.5)
    proj_b = jax.random.normal(ks[3], (1, C), jnp.float32) * 0.1

    # CIM conv weights: convMain[i] is a (1,1,1,1) scalar (diagonal),
    # convRest[i] is (1, H-1, 1, 1) -> off-diagonal row (skipping i).
    w_main = jax.random.normal(ks[4], (H,), jnp.float32) * 0.5
    w_rest = jax.random.normal(ks[5], (H, H - 1), jnp.float32) * 0.5
    mix_np = np.zeros((H, H), dtype=np.float32)
    for i in range(H):
        mix_np[i, i] = float(w_main[i])
        cols = [j for j in range(H) if j != i]
        for t, j in enumerate(cols):
            mix_np[i, j] = float(w_rest[i, t])
    mix = jnp.asarray(mix_np)

    ln1_g = 1.0 + 0.1 * jax.random.normal(ks[6], (1, C), jnp.float32)
    ln1_b = 0.1 * jax.random.normal(ks[7], (1, C), jnp.float32)
    ln2_g = 1.0 + 0.1 * jax.random.normal(ks[8], (1, C), jnp.float32)
    ln2_b = 0.1 * jax.random.normal(ks[9], (1, C), jnp.float32)
    w1 = jax.random.normal(ks[10], (C, Dh), jnp.float32) * (C ** -0.5)
    b1 = 0.1 * jax.random.normal(ks[11], (1, Dh), jnp.float32)
    w2 = jax.random.normal(ks[12], (Dh, C), jnp.float32) * (Dh ** -0.5)
    b2 = 0.1 * jax.random.normal(ks[13], (1, C), jnp.float32)

    params = dict(qkv_w=qkv_w, proj_w=proj_w, proj_b=proj_b, mix=mix,
                  ln1_g=ln1_g, ln1_b=ln1_b, ln2_g=ln2_g, ln2_b=ln2_b,
                  w1=w1, b1=b1, w2=w2, b2=b2)

    ref = transformer_block_ref(x, params, H)

    # f32 path (tight check; approx-reciprocal softmax + scale-into-mix fold).
    out_f32 = jax.block_until_ready(
        transformer_block_pallas(x, params, H, compute_dtype=jnp.float32))
    np.testing.assert_allclose(np.asarray(out_f32), np.asarray(ref),
                               rtol=3e-3, atol=3e-3)

    # Default path: bf16 matmul operands (native MXU rate on v6e/v7x),
    # f32 accumulation and f32 LN/softmax/residual math; loose check.
    out_bf16 = jax.block_until_ready(transformer_block_pallas(x, params, H))
    np.testing.assert_allclose(np.asarray(out_bf16), np.asarray(ref),
                               rtol=2e-1, atol=2e-1)

    print("KERNEL_OK")
</pallas_src>

<mosaic_0001>
module attributes {stable_mosaic.version = 11 : i64} {
  func.func @transformer_block_kernel(%arg0: i32, %arg1: i32, %arg2: memref<1x16x32xf32, #tpu.memory_space<vmem>>, %arg3: memref<4x4xf32, #tpu.memory_space<smem>>, %arg4: memref<1x32xf32, #tpu.memory_space<vmem>>, %arg5: memref<1x32xf32, #tpu.memory_space<vmem>>, %arg6: memref<4x32x8xf32, #tpu.memory_space<vmem>>, %arg7: memref<4x32x8xf32, #tpu.memory_space<vmem>>, %arg8: memref<4x32x8xf32, #tpu.memory_space<vmem>>, %arg9: memref<4x8x32xf32, #tpu.memory_space<vmem>>, %arg10: memref<1x32xf32, #tpu.memory_space<vmem>>, %arg11: memref<1x32xf32, #tpu.memory_space<vmem>>, %arg12: memref<1x32xf32, #tpu.memory_space<vmem>>, %arg13: memref<32x128xf32, #tpu.memory_space<vmem>>, %arg14: memref<1x128xf32, #tpu.memory_space<vmem>>, %arg15: memref<128x32xf32, #tpu.memory_space<vmem>>, %arg16: memref<1x32xf32, #tpu.memory_space<vmem>>, %arg17: memref<1x16x32xf32, #tpu.memory_space<vmem>>, %arg18: memref<16x32xf32, #tpu.memory_space<vmem>>, %arg19: memref<4x16x8xf32, #tpu.memory_space<vmem>>, %arg20: memref<4x16x8xf32, #tpu.memory_space<vmem>>, %arg21: memref<4x16x16xf32, #tpu.memory_space<vmem>>) attributes {dimension_semantics = [#tpu.dimension_semantics<parallel>, #tpu.dimension_semantics<arbitrary>], iteration_bounds = array<i64: 2, 1>, scalar_prefetch = 0 : i64, scratch_operands = 4 : i64, tpu.core_type = #tpu.core_type<tc>, window_params = [{transform_indices = @transform_0, window_bounds = array<i64: 1, 16, 32>}, {transform_indices = @transform_1, window_bounds = array<i64: 4, 4>}, {pipeline_mode = #tpu.pipeline_mode<synchronous>, transform_indices = @transform_2, window_bounds = array<i64: 1, 32>}, {pipeline_mode = #tpu.pipeline_mode<synchronous>, transform_indices = @transform_3, window_bounds = array<i64: 1, 32>}, {pipeline_mode = #tpu.pipeline_mode<synchronous>, transform_indices = @transform_4, window_bounds = array<i64: 4, 32, 8>}, {pipeline_mode = #tpu.pipeline_mode<synchronous>, transform_indices = @transform_5, window_bounds = array<i64: 4, 32, 8>}, {pipeline_mode = #tpu.pipeline_mode<synchronous>, transform_indices = @transform_6, window_bounds = array<i64: 4, 32, 8>}, {pipeline_mode = #tpu.pipeline_mode<synchronous>, transform_indices = @transform_7, window_bounds = array<i64: 4, 8, 32>}, {pipeline_mode = #tpu.pipeline_mode<synchronous>, transform_indices = @transform_8, window_bounds = array<i64: 1, 32>}, {pipeline_mode = #tpu.pipeline_mode<synchronous>, transform_indices = @transform_9, window_bounds = array<i64: 1, 32>}, {pipeline_mode = #tpu.pipeline_mode<synchronous>, transform_indices = @transform_10, window_bounds = array<i64: 1, 32>}, {pipeline_mode = #tpu.pipeline_mode<synchronous>, transform_indices = @transform_11, window_bounds = array<i64: 32, 128>}, {pipeline_mode = #tpu.pipeline_mode<synchronous>, transform_indices = @transform_12, window_bounds = array<i64: 1, 128>}, {pipeline_mode = #tpu.pipeline_mode<synchronous>, transform_indices = @transform_13, window_bounds = array<i64: 128, 32>}, {pipeline_mode = #tpu.pipeline_mode<synchronous>, transform_indices = @transform_14, window_bounds = array<i64: 1, 32>}, {transform_indices = @transform_15, window_bounds = array<i64: 1, 16, 32>}]} {
    %c0_i32 = arith.constant 0 : i32
    %0 = arith.cmpi eq, %arg1, %c0_i32 : i32
    %1 = arith.extui %0 : i1 to i32
    %c0_i32_0 = arith.constant 0 : i32
    %2 = arith.cmpi ne, %1, %c0_i32_0 : i32
    scf.if %2 {
      %c0_162 = arith.constant 0 : index
      %c0_163 = arith.constant 0 : index
      %c0_164 = arith.constant 0 : index
      %296 = vector.load %arg2[%c0_162, %c0_163, %c0_164] : memref<1x16x32xf32, #tpu.memory_space<vmem>>, vector<1x16x32xf32>
      %297 = vector.shape_cast %296 : vector<1x16x32xf32> to vector<16x32xf32>
      %c0_165 = arith.constant 0 : index
      %c0_166 = arith.constant 0 : index
      %298 = vector.load %arg4[%c0_165, %c0_166] : memref<1x32xf32, #tpu.memory_space<vmem>>, vector<1x32xf32>
      %c0_167 = arith.constant 0 : index
      %c0_168 = arith.constant 0 : index
      %299 = vector.load %arg5[%c0_167, %c0_168] : memref<1x32xf32, #tpu.memory_space<vmem>>, vector<1x32xf32>
      %cst_169 = arith.constant dense<0.000000e+00> : vector<16xf32>
      %300 = vector.multi_reduction <add>, %297, %cst_169 [1] : vector<16x32xf32> to vector<16xf32>
      %301 = vector.shape_cast %300 : vector<16xf32> to vector<16x1xf32>
      %cst_170 = arith.constant 3.200000e+01 : f32
      %302 = vector.broadcast %cst_170 : f32 to vector<16x1xf32>
      %303 = arith.divf %301, %302 : vector<16x1xf32>
      %304 = vector.broadcast %303 : vector<16x1xf32> to vector<16x32xf32>
      %305 = arith.subf %297, %304 : vector<16x32xf32>
      %306 = arith.mulf %305, %305 : vector<16x32xf32>
      %cst_171 = arith.constant dense<0.000000e+00> : vector<16xf32>
      %307 = vector.multi_reduction <add>, %306, %cst_171 [1] : vector<16x32xf32> to vector<16xf32>
      %308 = vector.shape_cast %307 : vector<16xf32> to vector<16x1xf32>
      %cst_172 = arith.constant 3.200000e+01 : f32
      %309 = vector.broadcast %cst_172 : f32 to vector<16x1xf32>
      %310 = arith.divf %308, %309 : vector<16x1xf32>
      %cst_173 = arith.constant 9.99999974E-6 : f32
      %311 = vector.broadcast %cst_173 : f32 to vector<16x1xf32>
      %312 = arith.addf %310, %311 : vector<16x1xf32>
      %313 = math.rsqrt %312 : vector<16x1xf32>
      %314 = vector.broadcast %313 : vector<16x1xf32> to vector<16x32xf32>
      %315 = arith.mulf %305, %314 : vector<16x32xf32>
      %316 = vector.broadcast %298 : vector<1x32xf32> to vector<16x32xf32>
      %317 = arith.mulf %315, %316 : vector<16x32xf32>
      %318 = vector.broadcast %299 : vector<1x32xf32> to vector<16x32xf32>
      %319 = arith.addf %317, %318 : vector<16x32xf32>
      %c0_174 = arith.constant 0 : index
      %c0_175 = arith.constant 0 : index
      %320 = vector.load %arg18[%c0_174, %c0_175] : memref<16x32xf32, #tpu.memory_space<vmem>>, vector<16x32xf32>
      tpu.vector_store %arg18[%c0_174, %c0_175], %319 {strides = array<i32>} : memref<16x32xf32, #tpu.memory_space<vmem>>, vector<16x32xf32>,
      %c0_i32_176 = arith.constant 0 : i32
      %321 = arith.index_cast %c0_i32_176 : i32 to index
      %c0_177 = arith.constant 0 : index
      %c0_178 = arith.constant 0 : index
      %322 = vector.load %arg7[%321, %c0_177, %c0_178] : memref<4x32x8xf32, #tpu.memory_space<vmem>>, vector<1x32x8xf32>
      %323 = vector.shape_cast %322 : vector<1x32x8xf32> to vector<32x8xf32>
      %cst_179 = arith.constant dense<0.000000e+00> : vector<16x8xf32>
      %324 = tpu.matmul %319, %323, %cst_179 {dimension_numbers = #tpu.dot_dimension_numbers<[1], [0], [0], [1], [0, 0, 1, 1], [], []>} : vector<16x32xf32>, vector<32x8xf32>, vector<16x8xf32> -> vector<16x8xf32>
      %325 = arith.index_cast %c0_i32_176 : i32 to index
      %c0_180 = arith.constant 0 : index
      %c0_181 = arith.constant 0 : index
      %326 = vector.load %arg19[%325, %c0_180, %c0_181] : memref<4x16x8xf32, #tpu.memory_space<vmem>>, vector<1x16x8xf32>
      %327 = vector.shape_cast %326 : vector<1x16x8xf32> to vector<16x8xf32>
      %328 = vector.shape_cast %324 : vector<16x8xf32> to vector<1x16x8xf32>
      tpu.vector_store %arg19[%325, %c0_180, %c0_181], %328 {strides = array<i32>} : memref<4x16x8xf32, #tpu.memory_space<vmem>>, vector<1x16x8xf32>,
      %329 = arith.index_cast %c0_i32_176 : i32 to index
      %c0_182 = arith.constant 0 : index
      %c0_183 = arith.constant 0 : index
      %330 = vector.load %arg8[%329, %c0_182, %c0_183] : memref<4x32x8xf32, #tpu.memory_space<vmem>>, vector<1x32x8xf32>
      %331 = vector.shape_cast %330 : vector<1x32x8xf32> to vector<32x8xf32>
      %cst_184 = arith.constant dense<0.000000e+00> : vector<16x8xf32>
      %332 = tpu.matmul %319, %331, %cst_184 {dimension_numbers = #tpu.dot_dimension_numbers<[1], [0], [0], [1], [0, 0, 1, 1], [], []>} : vector<16x32xf32>, vector<32x8xf32>, vector<16x8xf32> -> vector<16x8xf32>
      %333 = arith.index_cast %c0_i32_176 : i32 to index
      %c0_185 = arith.constant 0 : index
      %c0_186 = arith.constant 0 : index
      %334 = vector.load %arg20[%333, %c0_185, %c0_186] : memref<4x16x8xf32, #tpu.memory_space<vmem>>, vector<1x16x8xf32>
      %335 = vector.shape_cast %334 : vector<1x16x8xf32> to vector<16x8xf32>
      %336 = vector.shape_cast %332 : vector<16x8xf32> to vector<1x16x8xf32>
      tpu.vector_store %arg20[%333, %c0_185, %c0_186], %336 {strides = array<i32>} : memref<4x16x8xf32, #tpu.memory_space<vmem>>, vector<1x16x8xf32>,
      %c1_i32_187 = arith.constant 1 : i32
      %337 = arith.index_cast %c1_i32_187 : i32 to index
      %c0_188 = arith.constant 0 : index
      %c0_189 = arith.constant 0 : index
      %338 = vector.load %arg7[%337, %c0_188, %c0_189] : memref<4x32x8xf32, #tpu.memory_space<vmem>>, vector<1x32x8xf32>
      %339 = vector.shape_cast %338 : vector<1x32x8xf32> to vector<32x8xf32>
      %cst_190 = arith.constant dense<0.000000e+00> : vector<16x8xf32>
      %340 = tpu.matmul %319, %339, %cst_190 {dimension_numbers = #tpu.dot_dimension_numbers<[1], [0], [0], [1], [0, 0, 1, 1], [], []>} : vector<16x32xf32>, vector<32x8xf32>, vector<16x8xf32> -> vector<16x8xf32>
      %341 = arith.index_cast %c1_i32_187 : i32 to index
      %c0_191 = arith.constant 0 : index
      %c0_192 = arith.constant 0 : index
      %342 = vector.load %arg19[%341, %c0_191, %c0_192] : memref<4x16x8xf32, #tpu.memory_space<vmem>>, vector<1x16x8xf32>
      %343 = vector.shape_cast %342 : vector<1x16x8xf32> to vector<16x8xf32>
      %344 = vector.shape_cast %340 : vector<16x8xf32> to vector<1x16x8xf32>
      tpu.vector_store %arg19[%341, %c0_191, %c0_192], %344 {strides = array<i32>} : memref<4x16x8xf32, #tpu.memory_space<vmem>>, vector<1x16x8xf32>,
      %345 = arith.index_cast %c1_i32_187 : i32 to index
      %c0_193 = arith.constant 0 : index
      %c0_194 = arith.constant 0 : index
      %346 = vector.load %arg8[%345, %c0_193, %c0_194] : memref<4x32x8xf32, #tpu.memory_space<vmem>>, vector<1x32x8xf32>
      %347 = vector.shape_cast %346 : vector<1x32x8xf32> to vector<32x8xf32>
      %cst_195 = arith.constant dense<0.000000e+00> : vector<16x8xf32>
      %348 = tpu.matmul %319, %347, %cst_195 {dimension_numbers = #tpu.dot_dimension_numbers<[1], [0], [0], [1], [0, 0, 1, 1], [], []>} : vector<16x32xf32>, vector<32x8xf32>, vector<16x8xf32> -> vector<16x8xf32>
      %349 = arith.index_cast %c1_i32_187 : i32 to index
      %c0_196 = arith.constant 0 : index
      %c0_197 = arith.constant 0 : index
      %350 = vector.load %arg20[%349, %c0_196, %c0_197] : memref<4x16x8xf32, #tpu.memory_space<vmem>>, vector<1x16x8xf32>
      %351 = vector.shape_cast %350 : vector<1x16x8xf32> to vector<16x8xf32>
      %352 = vector.shape_cast %348 : vector<16x8xf32> to vector<1x16x8xf32>
      tpu.vector_store %arg20[%349, %c0_196, %c0_197], %352 {strides = array<i32>} : memref<4x16x8xf32, #tpu.memory_space<vmem>>, vector<1x16x8xf32>,
      %c2_i32_198 = arith.constant 2 : i32
      %353 = arith.index_cast %c2_i32_198 : i32 to index
      %c0_199 = arith.constant 0 : index
      %c0_200 = arith.constant 0 : index
      %354 = vector.load %arg7[%353, %c0_199, %c0_200] : memref<4x32x8xf32, #tpu.memory_space<vmem>>, vector<1x32x8xf32>
      %355 = vector.shape_cast %354 : vector<1x32x8xf32> to vector<32x8xf32>
      %cst_201 = arith.constant dense<0.000000e+00> : vector<16x8xf32>
      %356 = tpu.matmul %319, %355, %cst_201 {dimension_numbers = #tpu.dot_dimension_numbers<[1], [0], [0], [1], [0, 0, 1, 1], [], []>} : vector<16x32xf32>, vector<32x8xf32>, vector<16x8xf32> -> vector<16x8xf32>
      %357 = arith.index_cast %c2_i32_198 : i32 to index
      %c0_202 = arith.constant 0 : index
      %c0_203 = arith.constant 0 : index
      %358 = vector.load %arg19[%357, %c0_202, %c0_203] : memref<4x16x8xf32, #tpu.memory_space<vmem>>, vector<1x16x8xf32>
      %359 = vector.shape_cast %358 : vector<1x16x8xf32> to vector<16x8xf32>
      %360 = vector.shape_cast %356 : vector<16x8xf32> to vector<1x16x8xf32>
      tpu.vector_store %arg19[%357, %c0_202, %c0_203], %360 {strides = array<i32>} : memref<4x16x8xf32, #tpu.memory_space<vmem>>, vector<1x16x8xf32>,
      %361 = arith.index_cast %c2_i32_198 : i32 to index
      %c0_204 = arith.constant 0 : index
      %c0_205 = arith.constant 0 : index
      %362 = vector.load %arg8[%361, %c0_204, %c0_205] : memref<4x32x8xf32, #tpu.memory_space<vmem>>, vector<1x32x8xf32>
      %363 = vector.shape_cast %362 : vector<1x32x8xf32> to vector<32x8xf32>
      %cst_206 = arith.constant dense<0.000000e+00> : vector<16x8xf32>
      %364 = tpu.matmul %319, %363, %cst_206 {dimension_numbers = #tpu.dot_dimension_numbers<[1], [0], [0], [1], [0, 0, 1, 1], [], []>} : vector<16x32xf32>, vector<32x8xf32>, vector<16x8xf32> -> vector<16x8xf32>
      %365 = arith.index_cast %c2_i32_198 : i32 to index
      %c0_207 = arith.constant 0 : index
      %c0_208 = arith.constant 0 : index
      %366 = vector.load %arg20[%365, %c0_207, %c0_208] : memref<4x16x8xf32, #tpu.memory_space<vmem>>, vector<1x16x8xf32>
      %367 = vector.shape_cast %366 : vector<1x16x8xf32> to vector<16x8xf32>
      %368 = vector.shape_cast %364 : vector<16x8xf32> to vector<1x16x8xf32>
      tpu.vector_store %arg20[%365, %c0_207, %c0_208], %368 {strides = array<i32>} : memref<4x16x8xf32, #tpu.memory_space<vmem>>, vector<1x16x8xf32>,
      %c3_i32_209 = arith.constant 3 : i32
      %369 = arith.index_cast %c3_i32_209 : i32 to index
      %c0_210 = arith.constant 0 : index
      %c0_211 = arith.constant 0 : index
      %370 = vector.load %arg7[%369, %c0_210, %c0_211] : memref<4x32x8xf32, #tpu.memory_space<vmem>>, vector<1x32x8xf32>
      %371 = vector.shape_cast %370 : vector<1x32x8xf32> to vector<32x8xf32>
      %cst_212 = arith.constant dense<0.000000e+00> : vector<16x8xf32>
      %372 = tpu.matmul %319, %371, %cst_212 {dimension_numbers = #tpu.dot_dimension_numbers<[1], [0], [0], [1], [0, 0, 1, 1], [], []>} : vector<16x32xf32>, vector<32x8xf32>, vector<16x8xf32> -> vector<16x8xf32>
      %373 = arith.index_cast %c3_i32_209 : i32 to index
      %c0_213 = arith.constant 0 : index
      %c0_214 = arith.constant 0 : index
      %374 = vector.load %arg19[%373, %c0_213, %c0_214] : memref<4x16x8xf32, #tpu.memory_space<vmem>>, vector<1x16x8xf32>
      %375 = vector.shape_cast %374 : vector<1x16x8xf32> to vector<16x8xf32>
      %376 = vector.shape_cast %372 : vector<16x8xf32> to vector<1x16x8xf32>
      tpu.vector_store %arg19[%373, %c0_213, %c0_214], %376 {strides = array<i32>} : memref<4x16x8xf32, #tpu.memory_space<vmem>>, vector<1x16x8xf32>,
      %377 = arith.index_cast %c3_i32_209 : i32 to index
      %c0_215 = arith.constant 0 : index
      %c0_216 = arith.constant 0 : index
      %378 = vector.load %arg8[%377, %c0_215, %c0_216] : memref<4x32x8xf32, #tpu.memory_space<vmem>>, vector<1x32x8xf32>
      %379 = vector.shape_cast %378 : vector<1x32x8xf32> to vector<32x8xf32>
      %cst_217 = arith.constant dense<0.000000e+00> : vector<16x8xf32>
      %380 = tpu.matmul %319, %379, %cst_217 {dimension_numbers = #tpu.dot_dimension_numbers<[1], [0], [0], [1], [0, 0, 1, 1], [], []>} : vector<16x32xf32>, vector<32x8xf32>, vector<16x8xf32> -> vector<16x8xf32>
      %381 = arith.index_cast %c3_i32_209 : i32 to index
      %c0_218 = arith.constant 0 : index
      %c0_219 = arith.constant 0 : index
      %382 = vector.load %arg20[%381, %c0_218, %c0_219] : memref<4x16x8xf32, #tpu.memory_space<vmem>>, vector<1x16x8xf32>
      %383 = vector.shape_cast %382 : vector<1x16x8xf32> to vector<16x8xf32>
      %384 = vector.shape_cast %380 : vector<16x8xf32> to vector<1x16x8xf32>
      tpu.vector_store %arg20[%381, %c0_218, %c0_219], %384 {strides = array<i32>} : memref<4x16x8xf32, #tpu.memory_space<vmem>>, vector<1x16x8xf32>,
      %c4_i32_220 = arith.constant 4 : i32
    } else {
    }
    %c16_i32 = arith.constant 16 : i32
    %3 = arith.muli %arg1, %c16_i32 : i32
    %4 = tpu.assume_multiple %3, 16 : i32
    %c0 = arith.constant 0 : index
    %5 = arith.index_cast %4 : i32 to index
    %c0_1 = arith.constant 0 : index
    %6 = vector.load %arg2[%c0, %5, %c0_1] : memref<1x16x32xf32, #tpu.memory_space<vmem>>, vector<1x16x32xf32>
    %7 = vector.shape_cast %6 : vector<1x16x32xf32> to vector<16x32xf32>
    %8 = arith.index_cast %4 : i32 to index
    %c0_2 = arith.constant 0 : index
    %9 = vector.load %arg18[%8, %c0_2] : memref<16x32xf32, #tpu.memory_space<vmem>>, vector<16x32xf32>
    %c0_i32_3 = arith.constant 0 : i32
    %10 = arith.index_cast %c0_i32_3 : i32 to index
    %c0_4 = arith.constant 0 : index
    %c0_5 = arith.constant 0 : index
    %11 = vector.load %arg6[%10, %c0_4, %c0_5] : memref<4x32x8xf32, #tpu.memory_space<vmem>>, vector<1x32x8xf32>
    %12 = vector.shape_cast %11 : vector<1x32x8xf32> to vector<32x8xf32>
    %cst = arith.constant dense<0.000000e+00> : vector<16x8xf32>
    %13 = tpu.matmul %9, %12, %cst {dimension_numbers = #tpu.dot_dimension_numbers<[1], [0], [0], [1], [0, 0, 1, 1], [], []>} : vector<16x32xf32>, vector<32x8xf32>, vector<16x8xf32> -> vector<16x8xf32>
    %14 = arith.index_cast %c0_i32_3 : i32 to index
    %c0_6 = arith.constant 0 : index
    %c0_7 = arith.constant 0 : index
    %15 = vector.load %arg19[%14, %c0_6, %c0_7] : memref<4x16x8xf32, #tpu.memory_space<vmem>>, vector<1x16x8xf32>
    %16 = vector.shape_cast %15 : vector<1x16x8xf32> to vector<16x8xf32>
    %cst_8 = arith.constant dense<0.000000e+00> : vector<16x16xf32>
    %17 = tpu.matmul %13, %16, %cst_8 {dimension_numbers = #tpu.dot_dimension_numbers<[1], [1], [0], [0], [0, 0, 1, 0], [], []>} : vector<16x8xf32>, vector<16x8xf32>, vector<16x16xf32> -> vector<16x16xf32>
    %18 = arith.index_cast %c0_i32_3 : i32 to index
    %c0_9 = arith.constant 0 : index
    %c0_10 = arith.constant 0 : index
    %19 = vector.load %arg21[%18, %c0_9, %c0_10] : memref<4x16x16xf32, #tpu.memory_space<vmem>>, vector<1x16x16xf32>
    %20 = vector.shape_cast %19 : vector<1x16x16xf32> to vector<16x16xf32>
    %21 = vector.shape_cast %17 : vector<16x16xf32> to vector<1x16x16xf32>
    tpu.vector_store %arg21[%18, %c0_9, %c0_10], %21 {strides = array<i32>} : memref<4x16x16xf32, #tpu.memory_space<vmem>>, vector<1x16x16xf32>,
    %c1_i32 = arith.constant 1 : i32
    %22 = arith.index_cast %c1_i32 : i32 to index
    %c0_11 = arith.constant 0 : index
    %c0_12 = arith.constant 0 : index
    %23 = vector.load %arg6[%22, %c0_11, %c0_12] : memref<4x32x8xf32, #tpu.memory_space<vmem>>, vector<1x32x8xf32>
    %24 = vector.shape_cast %23 : vector<1x32x8xf32> to vector<32x8xf32>
    %cst_13 = arith.constant dense<0.000000e+00> : vector<16x8xf32>
    %25 = tpu.matmul %9, %24, %cst_13 {dimension_numbers = #tpu.dot_dimension_numbers<[1], [0], [0], [1], [0, 0, 1, 1], [], []>} : vector<16x32xf32>, vector<32x8xf32>, vector<16x8xf32> -> vector<16x8xf32>
    %26 = arith.index_cast %c1_i32 : i32 to index
    %c0_14 = arith.constant 0 : index
    %c0_15 = arith.constant 0 : index
    %27 = vector.load %arg19[%26, %c0_14, %c0_15] : memref<4x16x8xf32, #tpu.memory_space<vmem>>, vector<1x16x8xf32>
    %28 = vector.shape_cast %27 : vector<1x16x8xf32> to vector<16x8xf32>
    %cst_16 = arith.constant dense<0.000000e+00> : vector<16x16xf32>
    %29 = tpu.matmul %25, %28, %cst_16 {dimension_numbers = #tpu.dot_dimension_numbers<[1], [1], [0], [0], [0, 0, 1, 0], [], []>} : vector<16x8xf32>, vector<16x8xf32>, vector<16x16xf32> -> vector<16x16xf32>
    %30 = arith.index_cast %c1_i32 : i32 to index
    %c0_17 = arith.constant 0 : index
    %c0_18 = arith.constant 0 : index
    %31 = vector.load %arg21[%30, %c0_17, %c0_18] : memref<4x16x16xf32, #tpu.memory_space<vmem>>, vector<1x16x16xf32>
    %32 = vector.shape_cast %31 : vector<1x16x16xf32> to vector<16x16xf32>
    %33 = vector.shape_cast %29 : vector<16x16xf32> to vector<1x16x16xf32>
    tpu.vector_store %arg21[%30, %c0_17, %c0_18], %33 {strides = array<i32>} : memref<4x16x16xf32, #tpu.memory_space<vmem>>, vector<1x16x16xf32>,
    %c2_i32 = arith.constant 2 : i32
    %34 = arith.index_cast %c2_i32 : i32 to index
    %c0_19 = arith.constant 0 : index
    %c0_20 = arith.constant 0 : index
    %35 = vector.load %arg6[%34, %c0_19, %c0_20] : memref<4x32x8xf32, #tpu.memory_space<vmem>>, vector<1x32x8xf32>
    %36 = vector.shape_cast %35 : vector<1x32x8xf32> to vector<32x8xf32>
    %cst_21 = arith.constant dense<0.000000e+00> : vector<16x8xf32>
    %37 = tpu.matmul %9, %36, %cst_21 {dimension_numbers = #tpu.dot_dimension_numbers<[1], [0], [0], [1], [0, 0, 1, 1], [], []>} : vector<16x32xf32>, vector<32x8xf32>, vector<16x8xf32> -> vector<16x8xf32>
    %38 = arith.index_cast %c2_i32 : i32 to index
    %c0_22 = arith.constant 0 : index
    %c0_23 = arith.constant 0 : index
    %39 = vector.load %arg19[%38, %c0_22, %c0_23] : memref<4x16x8xf32, #tpu.memory_space<vmem>>, vector<1x16x8xf32>
    %40 = vector.shape_cast %39 : vector<1x16x8xf32> to vector<16x8xf32>
    %cst_24 = arith.constant dense<0.000000e+00> : vector<16x16xf32>
    %41 = tpu.matmul %37, %40, %cst_24 {dimension_numbers = #tpu.dot_dimension_numbers<[1], [1], [0], [0], [0, 0, 1, 0], [], []>} : vector<16x8xf32>, vector<16x8xf32>, vector<16x16xf32> -> vector<16x16xf32>
    %42 = arith.index_cast %c2_i32 : i32 to index
    %c0_25 = arith.constant 0 : index
    %c0_26 = arith.constant 0 : index
    %43 = vector.load %arg21[%42, %c0_25, %c0_26] : memref<4x16x16xf32, #tpu.memory_space<vmem>>, vector<1x16x16xf32>
    %44 = vector.shape_cast %43 : vector<1x16x16xf32> to vector<16x16xf32>
    %45 = vector.shape_cast %41 : vector<16x16xf32> to vector<1x16x16xf32>
    tpu.vector_store %arg21[%42, %c0_25, %c0_26], %45 {strides = array<i32>} : memref<4x16x16xf32, #tpu.memory_space<vmem>>, vector<1x16x16xf32>,
    %c3_i32 = arith.constant 3 : i32
    %46 = arith.index_cast %c3_i32 : i32 to index
    %c0_27 = arith.constant 0 : index
    %c0_28 = arith.constant 0 : index
    %47 = vector.load %arg6[%46, %c0_27, %c0_28] : memref<4x32x8xf32, #tpu.memory_space<vmem>>, vector<1x32x8xf32>
    %48 = vector.shape_cast %47 : vector<1x32x8xf32> to vector<32x8xf32>
    %cst_29 = arith.constant dense<0.000000e+00> : vector<16x8xf32>
    %49 = tpu.matmul %9, %48, %cst_29 {dimension_numbers = #tpu.dot_dimension_numbers<[1], [0], [0], [1], [0, 0, 1, 1], [], []>} : vector<16x32xf32>, vector<32x8xf32>, vector<16x8xf32> -> vector<16x8xf32>
    %50 = arith.index_cast %c3_i32 : i32 to index
    %c0_30 = arith.constant 0 : index
    %c0_31 = arith.constant 0 : index
    %51 = vector.load %arg19[%50, %c0_30, %c0_31] : memref<4x16x8xf32, #tpu.memory_space<vmem>>, vector<1x16x8xf32>
    %52 = vector.shape_cast %51 : vector<1x16x8xf32> to vector<16x8xf32>
    %cst_32 = arith.constant dense<0.000000e+00> : vector<16x16xf32>
    %53 = tpu.matmul %49, %52, %cst_32 {dimension_numbers = #tpu.dot_dimension_numbers<[1], [1], [0], [0], [0, 0, 1, 0], [], []>} : vector<16x8xf32>, vector<16x8xf32>, vector<16x16xf32> -> vector<16x16xf32>
    %54 = arith.index_cast %c3_i32 : i32 to index
    %c0_33 = arith.constant 0 : index
    %c0_34 = arith.constant 0 : index
    %55 = vector.load %arg21[%54, %c0_33, %c0_34] : memref<4x16x16xf32, #tpu.memory_space<vmem>>, vector<1x16x16xf32>
    %56 = vector.shape_cast %55 : vector<1x16x16xf32> to vector<16x16xf32>
    %57 = vector.shape_cast %53 : vector<16x16xf32> to vector<1x16x16xf32>
    tpu.vector_store %arg21[%54, %c0_33, %c0_34], %57 {strides = array<i32>} : memref<4x16x16xf32, #tpu.memory_space<vmem>>, vector<1x16x16xf32>,
    %c4_i32 = arith.constant 4 : i32
    %cst_35 = arith.constant 0.000000e+00 : f32
    %58 = vector.broadcast %cst_35 : f32 to vector<16x32xf32>
    %c0_i32_36 = arith.constant 0 : i32
    %59 = arith.index_cast %c0_i32_36 : i32 to index
    %c0_37 = arith.constant 0 : index
    %60 = memref.load %arg3[%59, %c0_37] : memref<4x4xf32, #tpu.memory_space<smem>>
    %c0_38 = arith.constant 0 : index
    %c0_39 = arith.constant 0 : index
    %c0_40 = arith.constant 0 : index
    %61 = vector.load %arg21[%c0_38, %c0_39, %c0_40] : memref<4x16x16xf32, #tpu.memory_space<vmem>>, vector<1x16x16xf32>
    %62 = vector.shape_cast %61 : vector<1x16x16xf32> to vector<16x16xf32>
    %63 = vector.broadcast %60 : f32 to vector<16x16xf32>
    %64 = arith.mulf %63, %62 : vector<16x16xf32>
    %65 = arith.index_cast %c0_i32_36 : i32 to index
    %c1 = arith.constant 1 : index
    %66 = memref.load %arg3[%65, %c1] : memref<4x4xf32, #tpu.memory_space<smem>>
    %c1_41 = arith.constant 1 : index
    %c0_42 = arith.constant 0 : index
    %c0_43 = arith.constant 0 : index
    %67 = vector.load %arg21[%c1_41, %c0_42, %c0_43] : memref<4x16x16xf32, #tpu.memory_space<vmem>>, vector<1x16x16xf32>
    %68 = vector.shape_cast %67 : vector<1x16x16xf32> to vector<16x16xf32>
    %69 = vector.broadcast %66 : f32 to vector<16x16xf32>
    %70 = arith.mulf %69, %68 : vector<16x16xf32>
    %71 = arith.addf %64, %70 : vector<16x16xf32>
    %72 = arith.index_cast %c0_i32_36 : i32 to index
    %c2 = arith.constant 2 : index
    %73 = memref.load %arg3[%72, %c2] : memref<4x4xf32, #tpu.memory_space<smem>>
    %c2_44 = arith.constant 2 : index
    %c0_45 = arith.constant 0 : index
    %c0_46 = arith.constant 0 : index
    %74 = vector.load %arg21[%c2_44, %c0_45, %c0_46] : memref<4x16x16xf32, #tpu.memory_space<vmem>>, vector<1x16x16xf32>
    %75 = vector.shape_cast %74 : vector<1x16x16xf32> to vector<16x16xf32>
    %76 = vector.broadcast %73 : f32 to vector<16x16xf32>
    %77 = arith.mulf %76, %75 : vector<16x16xf32>
    %78 = arith.addf %71, %77 : vector<16x16xf32>
    %79 = arith.index_cast %c0_i32_36 : i32 to index
    %c3 = arith.constant 3 : index
    %80 = memref.load %arg3[%79, %c3] : memref<4x4xf32, #tpu.memory_space<smem>>
    %c3_47 = arith.constant 3 : index
    %c0_48 = arith.constant 0 : index
    %c0_49 = arith.constant 0 : index
    %81 = vector.load %arg21[%c3_47, %c0_48, %c0_49] : memref<4x16x16xf32, #tpu.memory_space<vmem>>, vector<1x16x16xf32>
    %82 = vector.shape_cast %81 : vector<1x16x16xf32> to vector<16x16xf32>
    %83 = vector.broadcast %80 : f32 to vector<16x16xf32>
    %84 = arith.mulf %83, %82 : vector<16x16xf32>
    %85 = arith.addf %78, %84 : vector<16x16xf32>
    %cst_50 = arith.constant dense<0xFF800000> : vector<16xf32>
    %86 = vector.multi_reduction <maximumf>, %85, %cst_50 [1] : vector<16x16xf32> to vector<16xf32>
    %87 = vector.shape_cast %86 : vector<16xf32> to vector<16x1xf32>
    %88 = vector.broadcast %87 : vector<16x1xf32> to vector<16x16xf32>
    %89 = arith.subf %85, %88 : vector<16x16xf32>
    %90 = math.exp %89 : vector<16x16xf32>
    %cst_51 = arith.constant dense<0.000000e+00> : vector<16xf32>
    %91 = vector.multi_reduction <add>, %90, %cst_51 [1] : vector<16x16xf32> to vector<16xf32>
    %92 = vector.shape_cast %91 : vector<16xf32> to vector<16x1xf32>
    %93 = tpu.reciprocal %92 {approx = true} : vector<16x1xf32> -> vector<16x1xf32>
    %94 = vector.broadcast %93 : vector<16x1xf32> to vector<16x16xf32>
    %95 = arith.mulf %90, %94 : vector<16x16xf32>
    %96 = arith.index_cast %c0_i32_36 : i32 to index
    %c0_52 = arith.constant 0 : index
    %c0_53 = arith.constant 0 : index
    %97 = vector.load %arg20[%96, %c0_52, %c0_53] : memref<4x16x8xf32, #tpu.memory_space<vmem>>, vector<1x16x8xf32>
    %98 = vector.shape_cast %97 : vector<1x16x8xf32> to vector<16x8xf32>
    %cst_54 = arith.constant dense<0.000000e+00> : vector<16x8xf32>
    %99 = tpu.matmul %95, %98, %cst_54 {dimension_numbers = #tpu.dot_dimension_numbers<[1], [0], [0], [1], [0, 0, 1, 1], [], []>} : vector<16x16xf32>, vector<16x8xf32>, vector<16x8xf32> -> vector<16x8xf32>
    %100 = arith.index_cast %c0_i32_36 : i32 to index
    %c0_55 = arith.constant 0 : index
    %c0_56 = arith.constant 0 : index
    %101 = vector.load %arg9[%100, %c0_55, %c0_56] : memref<4x8x32xf32, #tpu.memory_space<vmem>>, vector<1x8x32xf32>
    %102 = vector.shape_cast %101 : vector<1x8x32xf32> to vector<8x32xf32>
    %cst_57 = arith.constant dense<0.000000e+00> : vector<16x32xf32>
    %103 = tpu.matmul %99, %102, %cst_57 {dimension_numbers = #tpu.dot_dimension_numbers<[1], [0], [0], [1], [0, 0, 1, 1], [], []>} : vector<16x8xf32>, vector<8x32xf32>, vector<16x32xf32> -> vector<16x32xf32>
    %104 = arith.addf %58, %103 : vector<16x32xf32>
    %c1_i32_58 = arith.constant 1 : i32
    %105 = arith.index_cast %c1_i32_58 : i32 to index
    %c0_59 = arith.constant 0 : index
    %106 = memref.load %arg3[%105, %c0_59] : memref<4x4xf32, #tpu.memory_space<smem>>
    %c0_60 = arith.constant 0 : index
    %c0_61 = arith.constant 0 : index
    %c0_62 = arith.constant 0 : index
    %107 = vector.load %arg21[%c0_60, %c0_61, %c0_62] : memref<4x16x16xf32, #tpu.memory_space<vmem>>, vector<1x16x16xf32>
    %108 = vector.shape_cast %107 : vector<1x16x16xf32> to vector<16x16xf32>
    %109 = vector.broadcast %106 : f32 to vector<16x16xf32>
    %110 = arith.mulf %109, %108 : vector<16x16xf32>
    %111 = arith.index_cast %c1_i32_58 : i32 to index
    %c1_63 = arith.constant 1 : index
    %112 = memref.load %arg3[%111, %c1_63] : memref<4x4xf32, #tpu.memory_space<smem>>
    %c1_64 = arith.constant 1 : index
    %c0_65 = arith.constant 0 : index
    %c0_66 = arith.constant 0 : index
    %113 = vector.load %arg21[%c1_64, %c0_65, %c0_66] : memref<4x16x16xf32, #tpu.memory_space<vmem>>, vector<1x16x16xf32>
    %114 = vector.shape_cast %113 : vector<1x16x16xf32> to vector<16x16xf32>
    %115 = vector.broadcast %112 : f32 to vector<16x16xf32>
    %116 = arith.mulf %115, %114 : vector<16x16xf32>
    %117 = arith.addf %110, %116 : vector<16x16xf32>
    %118 = arith.index_cast %c1_i32_58 : i32 to index
    %c2_67 = arith.constant 2 : index
    %119 = memref.load %arg3[%118, %c2_67] : memref<4x4xf32, #tpu.memory_space<smem>>
    %c2_68 = arith.constant 2 : index
    %c0_69 = arith.constant 0 : index
    %c0_70 = arith.constant 0 : index
    %120 = vector.load %arg21[%c2_68, %c0_69, %c0_70] : memref<4x16x16xf32, #tpu.memory_space<vmem>>, vector<1x16x16xf32>
    %121 = vector.shape_cast %120 : vector<1x16x16xf32> to vector<16x16xf32>
    %122 = vector.broadcast %119 : f32 to vector<16x16xf32>
    %123 = arith.mulf %122, %121 : vector<16x16xf32>
    %124 = arith.addf %117, %123 : vector<16x16xf32>
    %125 = arith.index_cast %c1_i32_58 : i32 to index
    %c3_71 = arith.constant 3 : index
    %126 = memref.load %arg3[%125, %c3_71] : memref<4x4xf32, #tpu.memory_space<smem>>
    %c3_72 = arith.constant 3 : index
    %c0_73 = arith.constant 0 : index
    %c0_74 = arith.constant 0 : index
    %127 = vector.load %arg21[%c3_72, %c0_73, %c0_74] : memref<4x16x16xf32, #tpu.memory_space<vmem>>, vector<1x16x16xf32>
    %128 = vector.shape_cast %127 : vector<1x16x16xf32> to vector<16x16xf32>
    %129 = vector.broadcast %126 : f32 to vector<16x16xf32>
    %130 = arith.mulf %129, %128 : vector<16x16xf32>
    %131 = arith.addf %124, %130 : vector<16x16xf32>
    %cst_75 = arith.constant dense<0xFF800000> : vector<16xf32>
    %132 = vector.multi_reduction <maximumf>, %131, %cst_75 [1] : vector<16x16xf32> to vector<16xf32>
    %133 = vector.shape_cast %132 : vector<16xf32> to vector<16x1xf32>
    %134 = vector.broadcast %133 : vector<16x1xf32> to vector<16x16xf32>
    %135 = arith.subf %131, %134 : vector<16x16xf32>
    %136 = math.exp %135 : vector<16x16xf32>
    %cst_76 = arith.constant dense<0.000000e+00> : vector<16xf32>
    %137 = vector.multi_reduction <add>, %136, %cst_76 [1] : vector<16x16xf32> to vector<16xf32>
    %138 = vector.shape_cast %137 : vector<16xf32> to vector<16x1xf32>
    %139 = tpu.reciprocal %138 {approx = true} : vector<16x1xf32> -> vector<16x1xf32>
    %140 = vector.broadcast %139 : vector<16x1xf32> to vector<16x16xf32>
    %141 = arith.mulf %136, %140 : vector<16x16xf32>
    %142 = arith.index_cast %c1_i32_58 : i32 to index
    %c0_77 = arith.constant 0 : index
    %c0_78 = arith.constant 0 : index
    %143 = vector.load %arg20[%142, %c0_77, %c0_78] : memref<4x16x8xf32, #tpu.memory_space<vmem>>, vector<1x16x8xf32>
    %144 = vector.shape_cast %143 : vector<1x16x8xf32> to vector<16x8xf32>
    %cst_79 = arith.constant dense<0.000000e+00> : vector<16x8xf32>
    %145 = tpu.matmul %141, %144, %cst_79 {dimension_numbers = #tpu.dot_dimension_numbers<[1], [0], [0], [1], [0, 0, 1, 1], [], []>} : vector<16x16xf32>, vector<16x8xf32>, vector<16x8xf32> -> vector<16x8xf32>
    %146 = arith.index_cast %c1_i32_58 : i32 to index
    %c0_80 = arith.constant 0 : index
    %c0_81 = arith.constant 0 : index
    %147 = vector.load %arg9[%146, %c0_80, %c0_81] : memref<4x8x32xf32, #tpu.memory_space<vmem>>, vector<1x8x32xf32>
    %148 = vector.shape_cast %147 : vector<1x8x32xf32> to vector<8x32xf32>
    %cst_82 = arith.constant dense<0.000000e+00> : vector<16x32xf32>
    %149 = tpu.matmul %145, %148, %cst_82 {dimension_numbers = #tpu.dot_dimension_numbers<[1], [0], [0], [1], [0, 0, 1, 1], [], []>} : vector<16x8xf32>, vector<8x32xf32>, vector<16x32xf32> -> vector<16x32xf32>
    %150 = arith.addf %104, %149 : vector<16x32xf32>
    %c2_i32_83 = arith.constant 2 : i32
    %151 = arith.index_cast %c2_i32_83 : i32 to index
    %c0_84 = arith.constant 0 : index
    %152 = memref.load %arg3[%151, %c0_84] : memref<4x4xf32, #tpu.memory_space<smem>>
    %c0_85 = arith.constant 0 : index
    %c0_86 = arith.constant 0 : index
    %c0_87 = arith.constant 0 : index
    %153 = vector.load %arg21[%c0_85, %c0_86, %c0_87] : memref<4x16x16xf32, #tpu.memory_space<vmem>>, vector<1x16x16xf32>
    %154 = vector.shape_cast %153 : vector<1x16x16xf32> to vector<16x16xf32>
    %155 = vector.broadcast %152 : f32 to vector<16x16xf32>
    %156 = arith.mulf %155, %154 : vector<16x16xf32>
    %157 = arith.index_cast %c2_i32_83 : i32 to index
    %c1_88 = arith.constant 1 : index
    %158 = memref.load %arg3[%157, %c1_88] : memref<4x4xf32, #tpu.memory_space<smem>>
    %c1_89 = arith.constant 1 : index
    %c0_90 = arith.constant 0 : index
    %c0_91 = arith.constant 0 : index
    %159 = vector.load %arg21[%c1_89, %c0_90, %c0_91] : memref<4x16x16xf32, #tpu.memory_space<vmem>>, vector<1x16x16xf32>
    %160 = vector.shape_cast %159 : vector<1x16x16xf32> to vector<16x16xf32>
    %161 = vector.broadcast %158 : f32 to vector<16x16xf32>
    %162 = arith.mulf %161, %160 : vector<16x16xf32>
    %163 = arith.addf %156, %162 : vector<16x16xf32>
    %164 = arith.index_cast %c2_i32_83 : i32 to index
    %c2_92 = arith.constant 2 : index
    %165 = memref.load %arg3[%164, %c2_92] : memref<4x4xf32, #tpu.memory_space<smem>>
    %c2_93 = arith.constant 2 : index
    %c0_94 = arith.constant 0 : index
    %c0_95 = arith.constant 0 : index
    %166 = vector.load %arg21[%c2_93, %c0_94, %c0_95] : memref<4x16x16xf32, #tpu.memory_space<vmem>>, vector<1x16x16xf32>
    %167 = vector.shape_cast %166 : vector<1x16x16xf32> to vector<16x16xf32>
    %168 = vector.broadcast %165 : f32 to vector<16x16xf32>
    %169 = arith.mulf %168, %167 : vector<16x16xf32>
    %170 = arith.addf %163, %169 : vector<16x16xf32>
    %171 = arith.index_cast %c2_i32_83 : i32 to index
    %c3_96 = arith.constant 3 : index
    %172 = memref.load %arg3[%171, %c3_96] : memref<4x4xf32, #tpu.memory_space<smem>>
    %c3_97 = arith.constant 3 : index
    %c0_98 = arith.constant 0 : index
    %c0_99 = arith.constant 0 : index
    %173 = vector.load %arg21[%c3_97, %c0_98, %c0_99] : memref<4x16x16xf32, #tpu.memory_space<vmem>>, vector<1x16x16xf32>
    %174 = vector.shape_cast %173 : vector<1x16x16xf32> to vector<16x16xf32>
    %175 = vector.broadcast %172 : f32 to vector<16x16xf32>
    %176 = arith.mulf %175, %174 : vector<16x16xf32>
    %177 = arith.addf %170, %176 : vector<16x16xf32>
    %cst_100 = arith.constant dense<0xFF800000> : vector<16xf32>
    %178 = vector.multi_reduction <maximumf>, %177, %cst_100 [1] : vector<16x16xf32> to vector<16xf32>
    %179 = vector.shape_cast %178 : vector<16xf32> to vector<16x1xf32>
    %180 = vector.broadcast %179 : vector<16x1xf32> to vector<16x16xf32>
    %181 = arith.subf %177, %180 : vector<16x16xf32>
    %182 = math.exp %181 : vector<16x16xf32>
    %cst_101 = arith.constant dense<0.000000e+00> : vector<16xf32>
    %183 = vector.multi_reduction <add>, %182, %cst_101 [1] : vector<16x16xf32> to vector<16xf32>
    %184 = vector.shape_cast %183 : vector<16xf32> to vector<16x1xf32>
    %185 = tpu.reciprocal %184 {approx = true} : vector<16x1xf32> -> vector<16x1xf32>
    %186 = vector.broadcast %185 : vector<16x1xf32> to vector<16x16xf32>
    %187 = arith.mulf %182, %186 : vector<16x16xf32>
    %188 = arith.index_cast %c2_i32_83 : i32 to index
    %c0_102 = arith.constant 0 : index
    %c0_103 = arith.constant 0 : index
    %189 = vector.load %arg20[%188, %c0_102, %c0_103] : memref<4x16x8xf32, #tpu.memory_space<vmem>>, vector<1x16x8xf32>
    %190 = vector.shape_cast %189 : vector<1x16x8xf32> to vector<16x8xf32>
    %cst_104 = arith.constant dense<0.000000e+00> : vector<16x8xf32>
    %191 = tpu.matmul %187, %190, %cst_104 {dimension_numbers = #tpu.dot_dimension_numbers<[1], [0], [0], [1], [0, 0, 1, 1], [], []>} : vector<16x16xf32>, vector<16x8xf32>, vector<16x8xf32> -> vector<16x8xf32>
    %192 = arith.index_cast %c2_i32_83 : i32 to index
    %c0_105 = arith.constant 0 : index
    %c0_106 = arith.constant 0 : index
    %193 = vector.load %arg9[%192, %c0_105, %c0_106] : memref<4x8x32xf32, #tpu.memory_space<vmem>>, vector<1x8x32xf32>
    %194 = vector.shape_cast %193 : vector<1x8x32xf32> to vector<8x32xf32>
    %cst_107 = arith.constant dense<0.000000e+00> : vector<16x32xf32>
    %195 = tpu.matmul %191, %194, %cst_107 {dimension_numbers = #tpu.dot_dimension_numbers<[1], [0], [0], [1], [0, 0, 1, 1], [], []>} : vector<16x8xf32>, vector<8x32xf32>, vector<16x32xf32> -> vector<16x32xf32>
    %196 = arith.addf %150, %195 : vector<16x32xf32>
    %c3_i32_108 = arith.constant 3 : i32
    %197 = arith.index_cast %c3_i32_108 : i32 to index
    %c0_109 = arith.constant 0 : index
    %198 = memref.load %arg3[%197, %c0_109] : memref<4x4xf32, #tpu.memory_space<smem>>
    %c0_110 = arith.constant 0 : index
    %c0_111 = arith.constant 0 : index
    %c0_112 = arith.constant 0 : index
    %199 = vector.load %arg21[%c0_110, %c0_111, %c0_112] : memref<4x16x16xf32, #tpu.memory_space<vmem>>, vector<1x16x16xf32>
    %200 = vector.shape_cast %199 : vector<1x16x16xf32> to vector<16x16xf32>
    %201 = vector.broadcast %198 : f32 to vector<16x16xf32>
    %202 = arith.mulf %201, %200 : vector<16x16xf32>
    %203 = arith.index_cast %c3_i32_108 : i32 to index
    %c1_113 = arith.constant 1 : index
    %204 = memref.load %arg3[%203, %c1_113] : memref<4x4xf32, #tpu.memory_space<smem>>
    %c1_114 = arith.constant 1 : index
    %c0_115 = arith.constant 0 : index
    %c0_116 = arith.constant 0 : index
    %205 = vector.load %arg21[%c1_114, %c0_115, %c0_116] : memref<4x16x16xf32, #tpu.memory_space<vmem>>, vector<1x16x16xf32>
    %206 = vector.shape_cast %205 : vector<1x16x16xf32> to vector<16x16xf32>
    %207 = vector.broadcast %204 : f32 to vector<16x16xf32>
    %208 = arith.mulf %207, %206 : vector<16x16xf32>
    %209 = arith.addf %202, %208 : vector<16x16xf32>
    %210 = arith.index_cast %c3_i32_108 : i32 to index
    %c2_117 = arith.constant 2 : index
    %211 = memref.load %arg3[%210, %c2_117] : memref<4x4xf32, #tpu.memory_space<smem>>
    %c2_118 = arith.constant 2 : index
    %c0_119 = arith.constant 0 : index
    %c0_120 = arith.constant 0 : index
    %212 = vector.load %arg21[%c2_118, %c0_119, %c0_120] : memref<4x16x16xf32, #tpu.memory_space<vmem>>, vector<1x16x16xf32>
    %213 = vector.shape_cast %212 : vector<1x16x16xf32> to vector<16x16xf32>
    %214 = vector.broadcast %211 : f32 to vector<16x16xf32>
    %215 = arith.mulf %214, %213 : vector<16x16xf32>
    %216 = arith.addf %209, %215 : vector<16x16xf32>
    %217 = arith.index_cast %c3_i32_108 : i32 to index
    %c3_121 = arith.constant 3 : index
    %218 = memref.load %arg3[%217, %c3_121] : memref<4x4xf32, #tpu.memory_space<smem>>
    %c3_122 = arith.constant 3 : index
    %c0_123 = arith.constant 0 : index
    %c0_124 = arith.constant 0 : index
    %219 = vector.load %arg21[%c3_122, %c0_123, %c0_124] : memref<4x16x16xf32, #tpu.memory_space<vmem>>, vector<1x16x16xf32>
    %220 = vector.shape_cast %219 : vector<1x16x16xf32> to vector<16x16xf32>
    %221 = vector.broadcast %218 : f32 to vector<16x16xf32>
    %222 = arith.mulf %221, %220 : vector<16x16xf32>
    %223 = arith.addf %216, %222 : vector<16x16xf32>
    %cst_125 = arith.constant dense<0xFF800000> : vector<16xf32>
    %224 = vector.multi_reduction <maximumf>, %223, %cst_125 [1] : vector<16x16xf32> to vector<16xf32>
    %225 = vector.shape_cast %224 : vector<16xf32> to vector<16x1xf32>
    %226 = vector.broadcast %225 : vector<16x1xf32> to vector<16x16xf32>
    %227 = arith.subf %223, %226 : vector<16x16xf32>
    %228 = math.exp %227 : vector<16x16xf32>
    %cst_126 = arith.constant dense<0.000000e+00> : vector<16xf32>
    %229 = vector.multi_reduction <add>, %228, %cst_126 [1] : vector<16x16xf32> to vector<16xf32>
    %230 = vector.shape_cast %229 : vector<16xf32> to vector<16x1xf32>
    %231 = tpu.reciprocal %230 {approx = true} : vector<16x1xf32> -> vector<16x1xf32>
    %232 = vector.broadcast %231 : vector<16x1xf32> to vector<16x16xf32>
    %233 = arith.mulf %228, %232 : vector<16x16xf32>
    %234 = arith.index_cast %c3_i32_108 : i32 to index
    %c0_127 = arith.constant 0 : index
    %c0_128 = arith.constant 0 : index
    %235 = vector.load %arg20[%234, %c0_127, %c0_128] : memref<4x16x8xf32, #tpu.memory_space<vmem>>, vector<1x16x8xf32>
    %236 = vector.shape_cast %235 : vector<1x16x8xf32> to vector<16x8xf32>
    %cst_129 = arith.constant dense<0.000000e+00> : vector<16x8xf32>
    %237 = tpu.matmul %233, %236, %cst_129 {dimension_numbers = #tpu.dot_dimension_numbers<[1], [0], [0], [1], [0, 0, 1, 1], [], []>} : vector<16x16xf32>, vector<16x8xf32>, vector<16x8xf32> -> vector<16x8xf32>
    %238 = arith.index_cast %c3_i32_108 : i32 to index
    %c0_130 = arith.constant 0 : index
    %c0_131 = arith.constant 0 : index
    %239 = vector.load %arg9[%238, %c0_130, %c0_131] : memref<4x8x32xf32, #tpu.memory_space<vmem>>, vector<1x8x32xf32>
    %240 = vector.shape_cast %239 : vector<1x8x32xf32> to vector<8x32xf32>
    %cst_132 = arith.constant dense<0.000000e+00> : vector<16x32xf32>
    %241 = tpu.matmul %237, %240, %cst_132 {dimension_numbers = #tpu.dot_dimension_numbers<[1], [0], [0], [1], [0, 0, 1, 1], [], []>} : vector<16x8xf32>, vector<8x32xf32>, vector<16x32xf32> -> vector<16x32xf32>
    %242 = arith.addf %196, %241 : vector<16x32xf32>
    %c4_i32_133 = arith.constant 4 : i32
    %243 = arith.addf %7, %242 : vector<16x32xf32>
    %c0_134 = arith.constant 0 : index
    %c0_135 = arith.constant 0 : index
    %244 = vector.load %arg10[%c0_134, %c0_135] : memref<1x32xf32, #tpu.memory_space<vmem>>, vector<1x32xf32>
    %245 = vector.broadcast %244 : vector<1x32xf32> to vector<16x32xf32>
    %246 = arith.addf %243, %245 : vector<16x32xf32>
    %c0_136 = arith.constant 0 : index
    %c0_137 = arith.constant 0 : index
    %247 = vector.load %arg11[%c0_136, %c0_137] : memref<1x32xf32, #tpu.memory_space<vmem>>, vector<1x32xf32>
    %c0_138 = arith.constant 0 : index
    %c0_139 = arith.constant 0 : index
    %248 = vector.load %arg12[%c0_138, %c0_139] : memref<1x32xf32, #tpu.memory_space<vmem>>, vector<1x32xf32>
    %cst_140 = arith.constant dense<0.000000e+00> : vector<16xf32>
    %249 = vector.multi_reduction <add>, %246, %cst_140 [1] : vector<16x32xf32> to vector<16xf32>
    %250 = vector.shape_cast %249 : vector<16xf32> to vector<16x1xf32>
    %cst_141 = arith.constant 3.200000e+01 : f32
    %251 = vector.broadcast %cst_141 : f32 to vector<16x1xf32>
    %252 = arith.divf %250, %251 : vector<16x1xf32>
    %253 = vector.broadcast %252 : vector<16x1xf32> to vector<16x32xf32>
    %254 = arith.subf %246, %253 : vector<16x32xf32>
    %255 = arith.mulf %254, %254 : vector<16x32xf32>
    %cst_142 = arith.constant dense<0.000000e+00> : vector<16xf32>
    %256 = vector.multi_reduction <add>, %255, %cst_142 [1] : vector<16x32xf32> to vector<16xf32>
    %257 = vector.shape_cast %256 : vector<16xf32> to vector<16x1xf32>
    %cst_143 = arith.constant 3.200000e+01 : f32
    %258 = vector.broadcast %cst_143 : f32 to vector<16x1xf32>
    %259 = arith.divf %257, %258 : vector<16x1xf32>
    %cst_144 = arith.constant 9.99999974E-6 : f32
    %260 = vector.broadcast %cst_144 : f32 to vector<16x1xf32>
    %261 = arith.addf %259, %260 : vector<16x1xf32>
    %262 = math.rsqrt %261 : vector<16x1xf32>
    %263 = vector.broadcast %262 : vector<16x1xf32> to vector<16x32xf32>
    %264 = arith.mulf %254, %263 : vector<16x32xf32>
    %265 = vector.broadcast %247 : vector<1x32xf32> to vector<16x32xf32>
    %266 = arith.mulf %264, %265 : vector<16x32xf32>
    %267 = vector.broadcast %248 : vector<1x32xf32> to vector<16x32xf32>
    %268 = arith.addf %266, %267 : vector<16x32xf32>
    %c0_145 = arith.constant 0 : index
    %c0_146 = arith.constant 0 : index
    %269 = vector.load %arg13[%c0_145, %c0_146] : memref<32x128xf32, #tpu.memory_space<vmem>>, vector<32x128xf32>
    %cst_147 = arith.constant dense<0.000000e+00> : vector<16x128xf32>
    %270 = tpu.matmul %268, %269, %cst_147 {dimension_numbers = #tpu.dot_dimension_numbers<[1], [0], [0], [1], [0, 0, 1, 1], [], []>} : vector<16x32xf32>, vector<32x128xf32>, vector<16x128xf32> -> vector<16x128xf32>
    %c0_148 = arith.constant 0 : index
    %c0_149 = arith.constant 0 : index
    %271 = vector.load %arg14[%c0_148, %c0_149] : memref<1x128xf32, #tpu.memory_space<vmem>>, vector<1x128xf32>
    %272 = vector.broadcast %271 : vector<1x128xf32> to vector<16x128xf32>
    %273 = arith.addf %270, %272 : vector<16x128xf32>
    %cst_150 = arith.constant 5.000000e-01 : f32
    %274 = vector.broadcast %cst_150 : f32 to vector<16x128xf32>
    %275 = arith.mulf %274, %273 : vector<16x128xf32>
    %cst_151 = arith.constant 4.471500e-02 : f32
    %276 = vector.broadcast %cst_151 : f32 to vector<16x128xf32>
    %277 = arith.mulf %276, %273 : vector<16x128xf32>
    %278 = arith.mulf %277, %273 : vector<16x128xf32>
    %279 = arith.mulf %278, %273 : vector<16x128xf32>
    %280 = arith.addf %273, %279 : vector<16x128xf32>
    %cst_152 = arith.constant 0.797884583 : f32
    %281 = vector.broadcast %cst_152 : f32 to vector<16x128xf32>
    %282 = arith.mulf %281, %280 : vector<16x128xf32>
    %283 = math.tanh %282 : vector<16x128xf32>
    %cst_153 = arith.constant 1.000000e+00 : f32
    %284 = vector.broadcast %cst_153 : f32 to vector<16x128xf32>
    %285 = arith.addf %284, %283 : vector<16x128xf32>
    %286 = arith.mulf %275, %285 : vector<16x128xf32>
    %c0_154 = arith.constant 0 : index
    %c0_155 = arith.constant 0 : index
    %287 = vector.load %arg15[%c0_154, %c0_155] : memref<128x32xf32, #tpu.memory_space<vmem>>, vector<128x32xf32>
    %cst_156 = arith.constant dense<0.000000e+00> : vector<16x32xf32>
    %288 = tpu.matmul %286, %287, %cst_156 {dimension_numbers = #tpu.dot_dimension_numbers<[1], [0], [0], [1], [0, 0, 1, 1], [], []>} : vector<16x128xf32>, vector<128x32xf32>, vector<16x32xf32> -> vector<16x32xf32>
    %c0_157 = arith.constant 0 : index
    %c0_158 = arith.constant 0 : index
    %289 = vector.load %arg16[%c0_157, %c0_158] : memref<1x32xf32, #tpu.memory_space<vmem>>, vector<1x32xf32>
    %290 = vector.broadcast %289 : vector<1x32xf32> to vector<16x32xf32>
    %291 = arith.addf %288, %290 : vector<16x32xf32>
    %292 = arith.addf %246, %291 : vector<16x32xf32>
    %c0_159 = arith.constant 0 : index
    %c0_160 = arith.constant 0 : index
    %c0_161 = arith.constant 0 : index
    %293 = vector.load %arg17[%c0_159, %c0_160, %c0_161] : memref<1x16x32xf32, #tpu.memory_space<vmem>>, vector<1x16x32xf32>
    %294 = vector.shape_cast %293 : vector<1x16x32xf32> to vector<16x32xf32>
    %295 = vector.shape_cast %292 : vector<16x32xf32> to vector<1x16x32xf32>
    tpu.vector_store %arg17[%c0_159, %c0_160, %c0_161], %295 {strides = array<i32>} : memref<1x16x32xf32, #tpu.memory_space<vmem>>, vector<1x16x32xf32>,
    return
  }
  func.func @transform_0(%arg0: i32, %arg1: i32) -> (i32, i32, i32) {
    %c0_i32 = arith.constant 0 : i32
    %c0_i32_0 = arith.constant 0 : i32
    %c0_i32_1 = arith.constant 0 : i32
    return %arg0, %c0_i32, %c0_i32_0 : i32, i32, i32
  }
  func.func @transform_1(%arg0: i32, %arg1: i32) -> (i32, i32) {
    %c0_i32 = arith.constant 0 : i32
    %c0_i32_0 = arith.constant 0 : i32
    %c0_i32_1 = arith.constant 0 : i32
    return %c0_i32, %c0_i32_0 : i32, i32
  }
  func.func @transform_2(%arg0: i32, %arg1: i32) -> (i32, i32) {
    %c0_i32 = arith.constant 0 : i32
    %c0_i32_0 = arith.constant 0 : i32
    %c0_i32_1 = arith.constant 0 : i32
    return %c0_i32, %c0_i32_0 : i32, i32
  }
  func.func @transform_3(%arg0: i32, %arg1: i32) -> (i32, i32) {
    %c0_i32 = arith.constant 0 : i32
    %c0_i32_0 = arith.constant 0 : i32
    %c0_i32_1 = arith.constant 0 : i32
    return %c0_i32, %c0_i32_0 : i32, i32
  }
  func.func @transform_4(%arg0: i32, %arg1: i32) -> (i32, i32, i32) {
    %c0_i32 = arith.constant 0 : i32
    %c0_i32_0 = arith.constant 0 : i32
    %c0_i32_1 = arith.constant 0 : i32
    %c0_i32_2 = arith.constant 0 : i32
    return %c0_i32, %c0_i32_0, %c0_i32_1 : i32, i32, i32
  }
  func.func @transform_5(%arg0: i32, %arg1: i32) -> (i32, i32, i32) {
    %c0_i32 = arith.constant 0 : i32
    %c0_i32_0 = arith.constant 0 : i32
    %c0_i32_1 = arith.constant 0 : i32
    %c0_i32_2 = arith.constant 0 : i32
    return %c0_i32, %c0_i32_0, %c0_i32_1 : i32, i32, i32
  }
  func.func @transform_6(%arg0: i32, %arg1: i32) -> (i32, i32, i32) {
    %c0_i32 = arith.constant 0 : i32
    %c0_i32_0 = arith.constant 0 : i32
    %c0_i32_1 = arith.constant 0 : i32
    %c0_i32_2 = arith.constant 0 : i32
    return %c0_i32, %c0_i32_0, %c0_i32_1 : i32, i32, i32
  }
  func.func @transform_7(%arg0: i32, %arg1: i32) -> (i32, i32, i32) {
    %c0_i32 = arith.constant 0 : i32
    %c0_i32_0 = arith.constant 0 : i32
    %c0_i32_1 = arith.constant 0 : i32
    %c0_i32_2 = arith.constant 0 : i32
    return %c0_i32, %c0_i32_0, %c0_i32_1 : i32, i32, i32
  }
  func.func @transform_8(%arg0: i32, %arg1: i32) -> (i32, i32) {
    %c0_i32 = arith.constant 0 : i32
    %c0_i32_0 = arith.constant 0 : i32
    %c0_i32_1 = arith.constant 0 : i32
    return %c0_i32, %c0_i32_0 : i32, i32
  }
  func.func @transform_9(%arg0: i32, %arg1: i32) -> (i32, i32) {
    %c0_i32 = arith.constant 0 : i32
    %c0_i32_0 = arith.constant 0 : i32
    %c0_i32_1 = arith.constant 0 : i32
    return %c0_i32, %c0_i32_0 : i32, i32
  }
  func.func @transform_10(%arg0: i32, %arg1: i32) -> (i32, i32) {
    %c0_i32 = arith.constant 0 : i32
    %c0_i32_0 = arith.constant 0 : i32
    %c0_i32_1 = arith.constant 0 : i32
    return %c0_i32, %c0_i32_0 : i32, i32
  }
  func.func @transform_11(%arg0: i32, %arg1: i32) -> (i32, i32) {
    %c0_i32 = arith.constant 0 : i32
    %c0_i32_0 = arith.constant 0 : i32
    %c0_i32_1 = arith.constant 0 : i32
    return %c0_i32, %c0_i32_0 : i32, i32
  }
  func.func @transform_12(%arg0: i32, %arg1: i32) -> (i32, i32) {
    %c0_i32 = arith.constant 0 : i32
    %c0_i32_0 = arith.constant 0 : i32
    %c0_i32_1 = arith.constant 0 : i32
    return %c0_i32, %c0_i32_0 : i32, i32
  }
  func.func @transform_13(%arg0: i32, %arg1: i32) -> (i32, i32) {
    %c0_i32 = arith.constant 0 : i32
    %c0_i32_0 = arith.constant 0 : i32
    %c0_i32_1 = arith.constant 0 : i32
    return %c0_i32, %c0_i32_0 : i32, i32
  }
  func.func @transform_14(%arg0: i32, %arg1: i32) -> (i32, i32) {
    %c0_i32 = arith.constant 0 : i32
    %c0_i32_0 = arith.constant 0 : i32
    %c0_i32_1 = arith.constant 0 : i32
    return %c0_i32, %c0_i32_0 : i32, i32
  }
  func.func @transform_15(%arg0: i32, %arg1: i32) -> (i32, i32, i32) {
    %c0_i32 = arith.constant 0 : i32
    %c0_i32_0 = arith.constant 0 : i32
    return %arg0, %arg1, %c0_i32 : i32, i32, i32
  }
}

</mosaic_0001>

<bundles_post_ra>
// kernel: tpu_custom_call.1
= control target key start
LH: loop header
LB: loop body
LE: loop exit
PB: predicated region body
PF: predicated region fallthrough
CT: control target
= control target key end

     0   :  { %s5835_s0 = inlined_call_operand.hbm [shape: f32[2,16,32], index: 0, kind: input, shape index: {}]   ;;  %s5836_s1 = inlined_call_operand.hbm [shape: f32[4,4], index: 1, kind: input, shape index: {}]   ;;  %s5837_s2 = inlined_call_operand.hbm [shape: f32[1,32], index: 2, kind: input, shape index: {}]   ;;  %s5838_s3 = inlined_call_operand.hbm [shape: f32[1,32], index: 3, kind: input, shape index: {}]   ;;  %s5839_s4 = inlined_call_operand.hbm [shape: f32[4,32,8], index: 4, kind: input, shape index: {}]   ;;  %s5840_s5 = inlined_call_operand.hbm [shape: f32[4,32,8], index: 5, kind: input, shape index: {}]   ;;  %s5841_s6 = inlined_call_operand.hbm [shape: f32[4,32,8], index: 6, kind: input, shape index: {}]   ;;  %s5842_s7 = inlined_call_operand.hbm [shape: f32[4,8,32], index: 7, kind: input, shape index: {}]   ;;  %s5843_s8 = inlined_call_operand.hbm [shape: f32[1,32], index: 8, kind: input, shape index: {}]   ;;  %s5844_s9 = inlined_call_operand.hbm [shape: f32[1,32], index: 9, kind: input, shape index: {}]   ;;  %s5845_s10 = inlined_call_operand.hbm [shape: f32[1,32], index: 10, kind: input, shape index: {}]   ;;  %s5846_s11 = inlined_call_operand.hbm [shape: f32[32,128], index: 11, kind: input, shape index: {}]   ;;  %s5847_s12 = inlined_call_operand.hbm [shape: f32[1,128], index: 12, kind: input, shape index: {}]   ;;  %s5848_s13 = inlined_call_operand.hbm [shape: f32[128,32], index: 13, kind: input, shape index: {}]   ;;  %s5849_s14 = inlined_call_operand.hbm [shape: f32[1,32], index: 14, kind: input, shape index: {}]   ;;  %s5850_s15 = inlined_call_operand.hbm [shape: f32[2,16,32], index: 15, kind: output, shape index: {}]  }
   0x1   :  { %5866 = sst [smem:[#allocation48_spill]] %s5835_s0 }
   0x2   :  { %5867 = sst [smem:[#allocation49_spill]] %s5836_s1 }
   0x3   :  { %5868 = sst [smem:[#allocation50_spill]] %s5837_s2 }
   0x4   :  { %5869 = sst [smem:[#allocation51_spill]] %s5838_s3 }
   0x5   :  { %5870 = sst [smem:[#allocation52_spill]] %s5839_s4 }
   0x6   :  { %5871 = sst [smem:[#allocation53_spill]] %s5840_s5 }
   0x7   :  { %5872 = sst [smem:[#allocation54_spill]] %s5841_s6 }
   0x8   :  { %5873 = sst [smem:[#allocation55_spill]] %s5842_s7 }
   0x9   :  { %5874 = sst [smem:[#allocation56_spill]] %s5843_s8 }
   0xa   :  { %5875 = sst [smem:[#allocation57_spill]] %s5850_s15 }
   0xb   :  { %20 = vsyncpa [#allocation7], 0 }
   0xc   :  { %22 = vsyncpa [#allocation7 + $0x1], 0 }
   0xd   :  { %23 = vsyncpa [#allocation9], 0 }
   0xe   :  { %24 = vsyncpa [#allocation12], 0 }
   0xf   :  { %25 = vsyncpa [#allocation15], 0 }
  0x10   :  { %26 = vsyncpa [#allocation18], 0 }
  0x11   :  { %27 = vsyncpa [#allocation21], 0 }
  0x12   :  { %28 = vsyncpa [#allocation24], 0 }
  0x13   :  { %29 = vsyncpa [#allocation27], 0 }
  0x14   :  { %30 = vsyncpa [#allocation30], 0 }
  0x15   :  { %31 = vsyncpa [#allocation8], 0 }
  0x16   :  { %33 = vsyncpa [#allocation8 + $0x1], 0  ;;  %s5079_s18 = smov 0   ;;  %s5081_s19 = smov 0  }
  0x17   :  { %5876 = sst [smem:[#allocation42_spill]] %s5081_s19  ;;  %s5083_s20 = smov 0  }
  0x18   :  { %s5085_s21 = smov 0   ;;  %s5087_s22 = smov 0  }
  0x19   :  { %s5089_s23 = smov 0  }
  0x1a LB: > { %s5878_s19 = sld [smem:[#allocation42_spill]]  ;;  %5881 = sst [smem:[#allocation44_spill]] %s4965_s20  ;;  %s4977_s23 = sphi %s5089_s23, %s39_s23   ;;  %s4973_s22 = sphi %s5087_s22, %s5932_s22   ;;  %s4969_s21 = sphi %s5085_s21, %s5931_s21   ;;  %s4965_s20 = sphi %s5083_s20, %s5930_s20   ;;  %s4957_s18 = sphi %s5079_s18, %s5926_s18  }
  0x1b   : > { %5879 = sst [smem:[#allocation42_spill]] %s4957_s18  ;;  %s4979_s24 = smov [#allocation11]  }
  0x1c   : > { %5882 = sst [smem:[#allocation45_spill]] %s4969_s21  ;;  %s426_s25 = sshll.u32 %s4979_s24, 4  ;;  %s5118_s25 = int_to_ptr.vmem [resolvable:$true] %s426_s25 }
  0x1d   : > { %s5851_s26 = sadd.s32 4294967295, %s4977_s23   ;;  %p3505_p0 = scmp.ge.s32.totalorder %s4977_s23, 1 }
  0x1e   : > { %p5113_p1 = scmp.eq.s32.totalorder %s5851_s26, 0  ;;  %p404_p2 = scmp.lt.s32.totalorder %s4977_s23, 3 }
  0x1f   : > { %s4980_s29 = smov [#allocation14]   ;;  %s4981_s17 = smov [#allocation17]  }
  0x20   : > { %5880 = sst [smem:[#allocation43_spill]] %s5878_s19  ;;  %p5120_p3 = pnand %p3505_p0, %p404_p2 }
  0x21   : > { %s5883_s27 = scalar_select %p5113_p1, 1, 0 }
  0x22   : > { %s5885_s28 = scalar_select %p5120_p3, 1, 0 }
  0x23   : > { %5884 = sst [smem:[#allocation46_spill]] %s5883_s27  ;;  %p4264_p5 = pneg %p5120_p3 }
  0x24   : > { %5886 = sst [smem:[#allocation47_spill]] %s5885_s28  ;;  %s447_s30 = sshll.u32 %s4980_s29, 4  ;;  %s5127_s30 = int_to_ptr.vmem [resolvable:$true] %s447_s30 }
  0x25   : > { %p5131_p6 = pnand %p4264_p5, %p5113_p1  ;;  %s473_s24 = sshll.u32 %s4981_s17, 4  ;;  %s5135_s24 = int_to_ptr.vmem [resolvable:$true] %s473_s24 }
  0x26   : > { %s5888_s2 = sld [smem:[#allocation50_spill]] }
  0x27   : > { %p5145_p8 = pneg %p5131_p6 }
  0x2c   : > { %s4456_s21 = scalar_lea.hbm %s5888_s2, 16 }
  0x2d   : > { %p4457_p7 = scmp.ne.s32.totalorder %s5888_s2, %s4456_s21  ;;  %p4463_p11 = scmp.lt.u32.totalorder %s4456_s21, %s5888_s2 }
  0x2f   : > { %p4459_p9 = pnand %p5145_p8, %p4457_p7 }
  0x31   : > { %p4460_p10 = pneg %p4459_p9 }
  0x33   : > { %p4465_p12 = pnand %p4463_p11, %p4460_p10 }
  0x35   : > { %4468 = shalt.err (!%p4465_p12)
}
  0x36   : > { %s4469_s0 = scalar_lea.vmem %s5118_s25, 16  ;;  %s4476_s15 = scalar_lea.vmem %s5118_s25, 32 }
  0x37   : > { %p4470_p13 = scmp.ne.s32.totalorder %s5118_s25, %s4469_s0  ;;  %p4477_p5 = scmp.lt.s32.totalorder %s5118_s25, %s5118_s25 }
  0x38   : > { %p4478_p7 = scmp.lt.s32.totalorder %s4476_s15, %s4469_s0 }
  0x39   : > { %p4472_p0 = pnand %p4470_p13, %p5145_p8 }
  0x3a   : > { %p4479_p9 = por %p4478_p7, %p4477_p5 }
  0x3b   : > { %p4473_p2 = pneg %p4472_p0 }
  0x3d   : > { %p4480_p4 = pnand %p4479_p9, %p4473_p2 }
  0x3f   : > { %4483 = shalt.err (!%p4480_p4)
}
  0x40   : > { %4270 = dma.hbm_to_vmem [thread:$0]  (!%p5131_p6), %s5888_s2, 16, %s5118_s25, [#allocation12]  }
  0x41   : > { %s5890_s4 = sld [smem:[#allocation52_spill]] }
  0x47   : > { %s4484_s17 = scalar_lea.hbm %s5890_s4, 2048 }
  0x48   : > { %p4485_p10 = scmp.ne.s32.totalorder %s5890_s4, %s4484_s17  ;;  %p4491_p4 = scmp.lt.u32.totalorder %s4484_s17, %s5890_s4 }
  0x4a   : > { %p4487_p11 = pnand %p4485_p10, %p5145_p8 }
  0x4c   : > { %p4488_p12 = pneg %p4487_p11 }
  0x4e   : > { %p4493_p13 = pnand %p4491_p4, %p4488_p12 }
  0x50   : > { %4496 = shalt.err (!%p4493_p13)
}
  0x51   : > { %s4497_s25 = scalar_lea.vmem %s5127_s30, 2048  ;;  %p4505_p7 = scmp.lt.s32.totalorder %s5127_s30, %s5127_s30 }
  0x52   : > { %p4498_p0 = scmp.ne.s32.totalorder %s5127_s30, %s4497_s25  ;;  %p4506_p9 = scmp.lt.s32.totalorder %s4497_s25, %s4497_s25 }
  0x54   : > { %p4500_p2 = pnand %p4498_p0, %p5145_p8  ;;  %p4507_p10 = por %p4506_p9, %p4505_p7 }
  0x56   : > { %p4501_p5 = pneg %p4500_p2 }
  0x58   : > { %p4508_p11 = pnand %p4507_p10, %p4501_p5 }
  0x5a   : > { %4511 = shalt.err (!%p4508_p11)
}
  0x5b   : > { %s5863_s18 = smov 128   ;;  %s5862_s19 = smov 8  }
  0x5c   : > { %4276 = dma.hbm_to_vmem [thread:$0]  (!%p5131_p6), %s5890_s4, 2048, %s5127_s30, [#allocation15], %s5863_s18, %s5863_s18, %s5862_s19  }
  0x5d   : > { %s5891_s6 = sld [smem:[#allocation54_spill]] }
  0x63   : > { %s4512_s17 = scalar_lea.hbm %s5891_s6, 2048 }
  0x64   : > { %p4513_p12 = scmp.ne.s32.totalorder %s5891_s6, %s4512_s17  ;;  %p4519_p0 = scmp.lt.u32.totalorder %s4512_s17, %s5891_s6 }
  0x66   : > { %p4515_p4 = pnand %p4513_p12, %p5145_p8 }
  0x68   : > { %p4516_p13 = pneg %p4515_p4 }
  0x6a   : > { %p4521_p2 = pnand %p4519_p0, %p4516_p13 }
  0x6c   : > { %4524 = shalt.err (!%p4521_p2)
}
  0x6d   : > { %s4525_s30 = scalar_lea.vmem %s5135_s24, 2048  ;;  %p4533_p10 = scmp.lt.s32.totalorder %s5135_s24, %s5135_s24 }
  0x6e   : > { %p4526_p5 = scmp.ne.s32.totalorder %s5135_s24, %s4525_s30  ;;  %p4534_p11 = scmp.lt.s32.totalorder %s4525_s30, %s4525_s30 }
  0x70   : > { %p4528_p7 = pnand %p4526_p5, %p5145_p8  ;;  %p4535_p12 = por %p4534_p11, %p4533_p10 }
  0x72   : > { %p4529_p9 = pneg %p4528_p7 }
  0x74   : > { %p4536_p4 = pnand %p4535_p12, %p4529_p9 }
  0x76   : > { %4539 = shalt.err (!%p4536_p4)
}
  0x77   : > { %4282 = dma.hbm_to_vmem [thread:$0]  (!%p5131_p6), %s5891_s6, 2048, %s5135_s24, [#allocation18], %s5863_s18, %s5863_s18, %s5862_s19  }
  0x78   : > { %s4984_s26 = smov [#allocation20]   ;;  %s4985_s28 = smov [#allocation23]  }
  0x79   : > { %s500_s27 = sshll.u32 %s4984_s26, 4  ;;  %s522_s17 = sshll.u32 %s4985_s28, 4  ;;  %s501_s27 = int_to_ptr.vmem [resolvable:$true] %s500_s27  ;;  %s523_s17 = int_to_ptr.vmem [resolvable:$true] %s522_s17 }
  0x7a   : > { %s5892_s8 = sld [smem:[#allocation56_spill]] }
  0x80   : > { %s4540_s25 = scalar_lea.hbm %s5892_s8, 16 }
  0x81   : > { %p4541_p13 = scmp.ne.s32.totalorder %s5892_s8, %s4540_s25  ;;  %p4547_p5 = scmp.lt.u32.totalorder %s4540_s25, %s5892_s8 }
  0x83   : > { %p4543_p0 = pnand %p4541_p13, %p5145_p8 }
  0x85   : > { %p4544_p2 = pneg %p4543_p0 }
  0x87   : > { %p4549_p7 = pnand %p4547_p5, %p4544_p2 }
  0x89   : > { %4552 = shalt.err (!%p4549_p7)
}
  0x8a   : > { %s4553_s24 = scalar_lea.vmem %s501_s27, 16  ;;  %s4560_s21 = scalar_lea.vmem %s501_s27, 32 }
  0x8b   : > { %p4554_p9 = scmp.ne.s32.totalorder %s501_s27, %s4553_s24  ;;  %p4561_p12 = scmp.lt.s32.totalorder %s501_s27, %s501_s27 }
  0x8c   : > { %p4562_p4 = scmp.lt.s32.totalorder %s4560_s21, %s4553_s24 }
  0x8d   : > { %p4556_p10 = pnand %p4554_p9, %p5145_p8 }
  0x8e   : > { %p4563_p3 = por %p4562_p4, %p4561_p12 }
  0x8f   : > { %p4557_p11 = pneg %p4556_p10 }
  0x91   : > { %p4564_p1 = pnand %p4563_p3, %p4557_p11 }
  0x93   : > { %4567 = shalt.err (!%p4564_p1)
}
  0x94   : > { %4288 = dma.hbm_to_vmem [thread:$0]  (!%p5131_p6), %s5892_s8, 16, %s501_s27, [#allocation21]  }
  0x95   : > { %s4568_s0 = scalar_lea.hbm %s5845_s10, 16 }
  0x96   : > { %p4569_p13 = scmp.ne.s32.totalorder %s5845_s10, %s4568_s0  ;;  %p4575_p1 = scmp.lt.u32.totalorder %s4568_s0, %s5845_s10 }
  0x98   : > { %p4571_p0 = pnand %p4569_p13, %p5145_p8 }
  0x9a   : > { %p4572_p3 = pneg %p4571_p0 }
  0x9c   : > { %p4577_p2 = pnand %p4575_p1, %p4572_p3 }
  0x9e   : > { %4580 = shalt.err (!%p4577_p2)
}
  0x9f   : > { %s4581_s24 = scalar_lea.vmem %s523_s17, 16  ;;  %s4588_s27 = scalar_lea.vmem %s523_s17, 32 }
  0xa0   : > { %p4582_p5 = scmp.ne.s32.totalorder %s523_s17, %s4581_s24  ;;  %p4589_p10 = scmp.lt.s32.totalorder %s523_s17, %s523_s17 }
  0xa1   : > { %p4590_p11 = scmp.lt.s32.totalorder %s4588_s27, %s4581_s24 }
  0xa2   : > { %p4584_p7 = pnand %p4582_p5, %p5145_p8 }
  0xa3   : > { %p4591_p12 = por %p4590_p11, %p4589_p10 }
  0xa4   : > { %p4585_p9 = pneg %p4584_p7 }
  0xa6   : > { %p4592_p4 = pnand %p4591_p12, %p4585_p9 }
  0xa8   : > { %4595 = shalt.err (!%p4592_p4)
}
  0xa9   : > { %4294 = dma.hbm_to_vmem [thread:$0]  (!%p5131_p6), %s5845_s10, 16, %s523_s17, [#allocation24]  }
  0xaa   : > { %s4986_s26 = smov [#allocation26]   ;;  %s4596_s15 = scalar_lea.hbm %s5847_s12, 16 }
  0xab   : > { %s546_s20 = sshll.u32 %s4986_s26, 4  ;;  %p4597_p13 = scmp.ne.s32.totalorder %s5847_s12, %s4596_s15  ;;  %s547_s20 = int_to_ptr.vmem [resolvable:$true] %s546_s20 }
  0xac   : > { %p4603_p1 = scmp.lt.u32.totalorder %s4596_s15, %s5847_s12 }
  0xad   : > { %p4599_p0 = pnand %p4597_p13, %p5145_p8 }
  0xaf   : > { %p4600_p3 = pneg %p4599_p0 }
  0xb1   : > { %p4605_p2 = pnand %p4603_p1, %p4600_p3 }
  0xb3   : > { %4608 = shalt.err (!%p4605_p2)
}
  0xb4   : > { %s4609_s17 = scalar_lea.vmem %s547_s20, 16  ;;  %s4616_s27 = scalar_lea.vmem %s547_s20, 32 }
  0xb5   : > { %p4610_p5 = scmp.ne.s32.totalorder %s547_s20, %s4609_s17  ;;  %p4617_p10 = scmp.lt.s32.totalorder %s547_s20, %s547_s20 }
  0xb6   : > { %p4618_p11 = scmp.lt.s32.totalorder %s4616_s27, %s4609_s17 }
  0xb7   : > { %p4612_p7 = pnand %p4610_p5, %p5145_p8 }
  0xb8   : > { %p4619_p12 = por %p4618_p11, %p4617_p10 }
  0xb9   : > { %p4613_p9 = pneg %p4612_p7 }
  0xbb   : > { %p4620_p4 = pnand %p4619_p12, %p4613_p9 }
  0xbd   : > { %4623 = shalt.err (!%p4620_p4)
}
  0xbe   : > { %4300 = dma.hbm_to_vmem [thread:$0]  (!%p5131_p6), %s5847_s12, 16, %s547_s20, [#allocation27]  }
  0xbf   : > { %s5893_s1 = sld [smem:[#allocation49_spill]] }
  0xc5   : > { %s4624_s0 = scalar_lea.hbm %s5893_s1, 64 }
  0xc6   : > { %p4625_p13 = scmp.ne.s32.totalorder %s5893_s1, %s4624_s0  ;;  %p4631_p1 = scmp.lt.u32.totalorder %s4624_s0, %s5893_s1 }
  0xc8   : > { %p4627_p0 = pnand %p4625_p13, %p5145_p8 }
  0xca   : > { %p4628_p3 = pneg %p4627_p0 }
  0xcc   : > { %p4633_p2 = pnand %p4631_p1, %p4628_p3 }
  0xce   : > { %4636 = shalt.err (!%p4633_p2)
}
  0xcf   : > { %s4987_s24 = smov [#allocation10]   ;;  %s4988_s27 = smov [#allocation13]  }
  0xd0   : > { %4267 = dma.hbm_to_smem (!%p5131_p6), %s5893_s1, 64, %s4987_s24, [#allocation9]  }
  0xd1   : > { %s437_s21 = sshll.u32 %s4988_s27, 4  ;;  %s4989_s4 = smov [#allocation16]   ;;  %s438_s21 = int_to_ptr.vmem [resolvable:$true] %s437_s21 }
  0xd2   : > { %s460_s26 = sshll.u32 %s4989_s4, 4  ;;  %s5894_s3 = sld [smem:[#allocation51_spill]]  ;;  %s461_s26 = int_to_ptr.vmem [resolvable:$true] %s460_s26 }
  0xd8   : > { %s4637_s25 = scalar_lea.hbm %s5894_s3, 16 }
  0xd9   : > { %p4638_p5 = scmp.ne.s32.totalorder %s5894_s3, %s4637_s25  ;;  %p4644_p10 = scmp.lt.u32.totalorder %s4637_s25, %s5894_s3 }
  0xdb   : > { %p4640_p7 = pnand %p4638_p5, %p5145_p8 }
  0xdd   : > { %p4641_p9 = pneg %p4640_p7 }
  0xdf   : > { %p4646_p11 = pnand %p4644_p10, %p4641_p9 }
  0xe1   : > { %4649 = shalt.err (!%p4646_p11)
}
  0xe2   : > { %s4650_s24 = scalar_lea.vmem %s438_s21, 16  ;;  %s4657_s17 = scalar_lea.vmem %s438_s21, 32 }
  0xe3   : > { %p4651_p12 = scmp.ne.s32.totalorder %s438_s21, %s4650_s24  ;;  %p4658_p0 = scmp.lt.s32.totalorder %s438_s21, %s438_s21 }
  0xe4   : > { %p4659_p3 = scmp.lt.s32.totalorder %s4657_s17, %s4650_s24 }
  0xe5   : > { %p4653_p4 = pnand %p4651_p12, %p5145_p8 }
  0xe6   : > { %p4660_p1 = por %p4659_p3, %p4658_p0 }
  0xe7   : > { %p4654_p13 = pneg %p4653_p4 }
  0xe9   : > { %p4661_p2 = pnand %p4660_p1, %p4654_p13 }
  0xeb   : > { %4664 = shalt.err (!%p4661_p2)
}
  0xec   : > { %4273 = dma.hbm_to_vmem [thread:$0]  (!%p5131_p6), %s5894_s3, 16, %s438_s21, [#allocation12]  }
  0xed   : > { %s5895_s5 = sld [smem:[#allocation53_spill]] }
  0xf3   : > { %s4665_s25 = scalar_lea.hbm %s5895_s5, 2048 }
  0xf4   : > { %p4666_p5 = scmp.ne.s32.totalorder %s5895_s5, %s4665_s25  ;;  %p4672_p10 = scmp.lt.u32.totalorder %s4665_s25, %s5895_s5 }
  0xf6   : > { %p4668_p7 = pnand %p4666_p5, %p5145_p8 }
  0xf8   : > { %p4669_p9 = pneg %p4668_p7 }
  0xfa   : > { %p4674_p11 = pnand %p4672_p10, %p4669_p9 }
  0xfc   : > { %4677 = shalt.err (!%p4674_p11)
}
  0xfd   : > { %s4678_s24 = scalar_lea.vmem %s461_s26, 2048  ;;  %p4686_p0 = scmp.lt.s32.totalorder %s461_s26, %s461_s26 }
  0xfe   : > { %p4679_p12 = scmp.ne.s32.totalorder %s461_s26, %s4678_s24  ;;  %p4687_p3 = scmp.lt.s32.totalorder %s4678_s24, %s4678_s24 }
 0x100   : > { %p4681_p4 = pnand %p4679_p12, %p5145_p8  ;;  %p4688_p1 = por %p4687_p3, %p4686_p0 }
 0x102   : > { %p4682_p13 = pneg %p4681_p4 }
 0x104   : > { %p4689_p2 = pnand %p4688_p1, %p4682_p13 }
 0x106   : > { %4692 = shalt.err (!%p4689_p2)
}
 0x107   : > { %4279 = dma.hbm_to_vmem [thread:$0]  (!%p5131_p6), %s5895_s5, 2048, %s461_s26, [#allocation15], %s5863_s18, %s5863_s18, %s5862_s19  }
 0x108   : > { %s4990_s27 = smov [#allocation19]   ;;  %s4991_s28 = smov [#allocation22]  }
 0x109   : > { %s486_s4 = sshll.u32 %s4990_s27, 4  ;;  %s511_s15 = sshll.u32 %s4991_s28, 4  ;;  %s487_s4 = int_to_ptr.vmem [resolvable:$true] %s486_s4  ;;  %s512_s15 = int_to_ptr.vmem [resolvable:$true] %s511_s15 }
 0x10a   : > { %s5896_s7 = sld [smem:[#allocation55_spill]] }
 0x110   : > { %s4693_s30 = scalar_lea.hbm %s5896_s7, 512 }
 0x111   : > { %p4694_p5 = scmp.ne.s32.totalorder %s5896_s7, %s4693_s30  ;;  %p4700_p10 = scmp.lt.u32.totalorder %s4693_s30, %s5896_s7 }
 0x113   : > { %p4696_p7 = pnand %p4694_p5, %p5145_p8 }
 0x115   : > { %p4697_p9 = pneg %p4696_p7 }
 0x117   : > { %p4702_p11 = pnand %p4700_p10, %p4697_p9 }
 0x119   : > { %4705 = shalt.err (!%p4702_p11)
}
 0x11a   : > { %s4706_s26 = scalar_lea.vmem %s487_s4, 512  ;;  %p4714_p0 = scmp.lt.s32.totalorder %s487_s4, %s487_s4 }
 0x11b   : > { %p4707_p12 = scmp.ne.s32.totalorder %s487_s4, %s4706_s26  ;;  %p4715_p3 = scmp.lt.s32.totalorder %s4706_s26, %s4706_s26 }
 0x11d   : > { %p4709_p4 = pnand %p4707_p12, %p5145_p8  ;;  %p4716_p1 = por %p4715_p3, %p4714_p0 }
 0x11f   : > { %p4710_p13 = pneg %p4709_p4 }
 0x121   : > { %p4717_p2 = pnand %p4716_p1, %p4710_p13 }
 0x123   : > { %4720 = shalt.err (!%p4717_p2)
}
 0x124   : > { %4285 = dma.hbm_to_vmem [thread:$0]  (!%p5131_p6), %s5896_s7, 512, %s487_s4, [#allocation18], %s5863_s18, %s5863_s18, %s5862_s19  }
 0x125   : > { %s4721_s0 = scalar_lea.hbm %s5844_s9, 16 }
 0x126   : > { %p4722_p5 = scmp.ne.s32.totalorder %s5844_s9, %s4721_s0  ;;  %p4728_p10 = scmp.lt.u32.totalorder %s4721_s0, %s5844_s9 }
 0x128   : > { %p4724_p7 = pnand %p4722_p5, %p5145_p8 }
 0x12a   : > { %p4725_p9 = pneg %p4724_p7 }
 0x12c   : > { %p4730_p11 = pnand %p4728_p10, %p4725_p9 }
 0x12e   : > { %4733 = shalt.err (!%p4730_p11)
}
 0x12f   : > { %s4734_s21 = scalar_lea.vmem %s512_s15, 16  ;;  %s4741_s4 = scalar_lea.vmem %s512_s15, 32 }
 0x130   : > { %p4735_p12 = scmp.ne.s32.totalorder %s512_s15, %s4734_s21  ;;  %p4742_p0 = scmp.lt.s32.totalorder %s512_s15, %s512_s15 }
 0x131   : > { %p4743_p3 = scmp.lt.s32.totalorder %s4741_s4, %s4734_s21 }
 0x132   : > { %p4737_p4 = pnand %p4735_p12, %p5145_p8 }
 0x133   : > { %p4744_p1 = por %p4743_p3, %p4742_p0 }
 0x134   : > { %p4738_p13 = pneg %p4737_p4 }
 0x136   : > { %p4745_p2 = pnand %p4744_p1, %p4738_p13 }
 0x138   : > { %4748 = shalt.err (!%p4745_p2)
}
 0x139   : > { %4291 = dma.hbm_to_vmem [thread:$0]  (!%p5131_p6), %s5844_s9, 16, %s512_s15, [#allocation21]  }
 0x13a   : > { %s4992_s27 = smov [#allocation25]   ;;  %s4993_s25 = smov [#allocation28]  }
 0x13b   : > { %s532_s28 = sshll.u32 %s4992_s27, 4  ;;  %s556_s0 = sshll.u32 %s4993_s25, 4  ;;  %s533_s28 = int_to_ptr.vmem [resolvable:$true] %s532_s28  ;;  %s557_s0 = int_to_ptr.vmem [resolvable:$true] %s556_s0 }
 0x13c   : > { %s4749_s20 = scalar_lea.hbm %s5846_s11, 512 }
 0x13d   : > { %p4750_p5 = scmp.ne.s32.totalorder %s5846_s11, %s4749_s20  ;;  %p4756_p10 = scmp.lt.u32.totalorder %s4749_s20, %s5846_s11 }
 0x13f   : > { %p4752_p7 = pnand %p4750_p5, %p5145_p8 }
 0x141   : > { %p4753_p9 = pneg %p4752_p7 }
 0x143   : > { %p4758_p11 = pnand %p4756_p10, %p4753_p9 }
 0x145   : > { %4761 = shalt.err (!%p4758_p11)
}
 0x146   : > { %s4762_s15 = scalar_lea.vmem %s533_s28, 512  ;;  %p4770_p0 = scmp.lt.s32.totalorder %s533_s28, %s533_s28 }
 0x147   : > { %p4763_p12 = scmp.ne.s32.totalorder %s533_s28, %s4762_s15  ;;  %p4771_p3 = scmp.lt.s32.totalorder %s4762_s15, %s4762_s15 }
 0x149   : > { %p4765_p4 = pnand %p4763_p12, %p5145_p8  ;;  %p4772_p1 = por %p4771_p3, %p4770_p0 }
 0x14b   : > { %p4766_p13 = pneg %p4765_p4 }
 0x14d   : > { %p4773_p2 = pnand %p4772_p1, %p4766_p13 }
 0x14f   : > { %4776 = shalt.err (!%p4773_p2)
}
 0x150   : > { %4297 = dma.hbm_to_vmem [thread:$0]  (!%p5131_p6), %s5846_s11, 512, %s533_s28, [#allocation24], %s5863_s18, %s5863_s18, %s5862_s19  }
 0x151   : > { %s4777_s2 = scalar_lea.hbm %s5848_s13, 2048 }
 0x152   : > { %p4778_p5 = scmp.ne.s32.totalorder %s5848_s13, %s4777_s2  ;;  %p4784_p10 = scmp.lt.u32.totalorder %s4777_s2, %s5848_s13 }
 0x154   : > { %p4780_p7 = pnand %p4778_p5, %p5145_p8 }
 0x156   : > { %p4781_p9 = pneg %p4780_p7 }
 0x158   : > { %p4786_p11 = pnand %p4784_p10, %p4781_p9 }
 0x15a   : > { %4789 = shalt.err (!%p4786_p11)
}
 0x15b   : > { %s4790_s26 = scalar_lea.vmem %s557_s0, 2048  ;;  %p4798_p0 = scmp.lt.s32.totalorder %s557_s0, %s557_s0 }
 0x15c   : > { %p4791_p12 = scmp.ne.s32.totalorder %s557_s0, %s4790_s26  ;;  %p4799_p3 = scmp.lt.s32.totalorder %s4790_s26, %s4790_s26 }
 0x15e   : > { %p4793_p4 = pnand %p4791_p12, %p5145_p8  ;;  %p4800_p1 = por %p4799_p3, %p4798_p0 }
 0x160   : > { %p4794_p13 = pneg %p4793_p4 }
 0x162   : > { %p4801_p2 = pnand %p4800_p1, %p4794_p13 }
 0x164   : > { %4804 = shalt.err (!%p4801_p2)
}
 0x165   : > { %4303 = dma.hbm_to_vmem [thread:$0]  (!%p5131_p6), %s5848_s13, 2048, %s557_s0, [#allocation27], %s5863_s18, %s5863_s18, %s5862_s19  }
 0x166   : > { %s4994_s17 = smov [#allocation29]   ;;  %s4805_s2 = scalar_lea.hbm %s5849_s14, 16 }
 0x167   : > { %s570_s27 = sshll.u32 %s4994_s17, 4  ;;  %p4806_p5 = scmp.ne.s32.totalorder %s5849_s14, %s4805_s2  ;;  %s571_s27 = int_to_ptr.vmem [resolvable:$true] %s570_s27 }
 0x168   : > { %p4812_p10 = scmp.lt.u32.totalorder %s4805_s2, %s5849_s14 }
 0x169   : > { %p4808_p7 = pnand %p4806_p5, %p5145_p8 }
 0x16b   : > { %p4809_p9 = pneg %p4808_p7 }
 0x16d   : > { %p4814_p11 = pnand %p4812_p10, %p4809_p9 }
 0x16f   : > { %4817 = shalt.err (!%p4814_p11)
}
 0x170   : > { %s4818_s0 = scalar_lea.vmem %s571_s27, 16  ;;  %s4825_s26 = scalar_lea.vmem %s571_s27, 32 }
 0x171   : > { %p4819_p12 = scmp.ne.s32.totalorder %s571_s27, %s4818_s0  ;;  %p4826_p0 = scmp.lt.s32.totalorder %s571_s27, %s571_s27 }
 0x172   : > { %p4827_p3 = scmp.lt.s32.totalorder %s4825_s26, %s4818_s0 }
 0x173   : > { %p4821_p4 = pnand %p4819_p12, %p5145_p8 }
 0x174   : > { %p4828_p1 = por %p4827_p3, %p4826_p0 }
 0x175   : > { %p4822_p13 = pneg %p4821_p4 }
 0x177   : > { %p4829_p2 = pnand %p4828_p1, %p4822_p13 }
 0x179   : > { %4832 = shalt.err (!%p4829_p2)
}
 0x17a   : > { %s5897_s17 = sld [smem:[#allocation44_spill]]  ;;  %s5898_s25 = sld [smem:[#allocation43_spill]] }
 0x17b   : > { %s5899_s29 = sld [smem:[#allocation42_spill]]  ;;  %s5900_s30 = sld [smem:[#allocation46_spill]] }
 0x17c   : > { %4306 = dma.hbm_to_vmem [thread:$0]  (!%p5131_p6), %s5849_s14, 16, %s571_s27, [#allocation30]  }
 0x17d   : > { %s3504_s2 = sadd.s32 4294967294, %s4977_s23   ;;  %s51_s20 = sadd.s32 1, %s4973_s22 }
 0x17e   : > { %p53_p8 = scmp.ge.s32.totalorder %s51_s20, 2  ;;  %p66_p7 = scmp.eq.s32.totalorder %s4977_s23, 0 }
 0x17f   : > { %s5902_s21 = sadd.s32 4294967295, %s4977_s23   ;;  %p397_p0 = scmp.eq.s32.totalorder %s3504_s2, 1 }
 0x180   : > { %s58_s16 = sadd.s32 1, %s5897_s17  ;;  %p65_p5 = scmp.ne.s32.totalorder %s5897_s17, %s5898_s25 }
 0x181   : > { %s5934_s20 = smov (%p53_p8, %s51_s20), 0  ;;  %p71_p10 = scmp.ne.s32.totalorder %s5898_s25, %s5899_s29 }
 0x182   : > { %p5435_p9 = por %p66_p7, %p65_p5  ;;  %s55_s27 = ssub.s32 %s4973_s22, %s5934_s20 }
 0x183   : > { %p391_p6 = scmp.eq.s32.totalorder %s5902_s21, 1  ;;  %p56_p11 = scmp.eq.s32.totalorder %s55_s27, 0 }
 0x184   : > { %p5903_p12 = scmp.ne.s32.totalorder %s5900_s30, 0  ;;  %p5458_p3 = por %p397_p0, %p71_p10 }
 0x185   : > { %p5451_p13 = por %p391_p6, %p65_p5  ;;  %p4329_p1 = scmp.lt.s32.totalorder %s4977_s23, 2 }
 0x186   : > { %p5447_p4 = por %p5903_p12, %p71_p10  ;;  %s581_s15 = sand.u32 1, %s5897_s17  }
 0x187   : > { %s5905_s0 = scalar_select %p5451_p13, 1, 0 }
 0x188   : > { %s5456_s26 = scalar_select %p56_p11, %s5897_s17, %s58_s16  }
 0x189   : > { %s5906_s28 = scalar_select %p5458_p3, 1, 0 }
 0x18a   : > { %s3626_s25 = sshll.u32 %s4973_s22, 8  ;;  %s3521_s29 = sshll.u32 %s581_s15, 4 }
 0x18b   : > { %s5907_s21 = sld [smem:[#allocation48_spill]]  ;;  %s585_s2 = scalar_lea.vmem [#allocation6], %s3521_s29 }
 0x18c   : > { %s592_s16 = sshll.u32 %s585_s2, 4  ;;  %p5472_p2 = pnand %p4329_p1, %p5435_p9  ;;  %s5476_s16 = int_to_ptr.vmem [resolvable:$true] %s592_s16 }
 0x18d   : > { %s5478_s17 = scalar_lea.sflag [#allocation7], %s581_s15 }
 0x18e   : > { %p4835_p5 = pneg %p5472_p2 }
 0x191   : > { %s5908_s19 = smov %s5907_s21  ;;  %s5468_s18 = scalar_lea.hbm %s5907_s21, %s3626_s25 }
 0x192   : > { %s4833_s30 = scalar_lea.hbm %s5468_s18, 256  ;;  %s4838_s29 = scalar_lea.hbm %s5908_s19, 512 }
 0x193   : > { %p4834_p8 = scmp.ne.s32.totalorder %s5468_s18, %s4833_s30  ;;  %p4839_p9 = scmp.lt.u32.totalorder %s5468_s18, %s5908_s19 }
 0x194   : > { %p4840_p6 = scmp.lt.u32.totalorder %s4838_s29, %s4833_s30  ;;  %p4842_p12 = scmp.lt.u32.totalorder %s4833_s30, %s5468_s18 }
 0x195   : > { %p4836_p7 = pnand %p4835_p5, %p4834_p8 }
 0x196   : > { %p4841_p11 = por %p4840_p6, %p4839_p9 }
 0x197   : > { %p4837_p10 = pneg %p4836_p7 }
 0x198   : > { %p4843_p0 = por %p4842_p12, %p4841_p11 }
 0x19a   : > { %p4844_p1 = pnand %p4843_p0, %p4837_p10 }
 0x19c   : > { %4847 = shalt.err (!%p4844_p1)
}
 0x19d   : > { %s4848_s15 = scalar_lea.vmem %s5476_s16, 256  ;;  %s4995_s2 = smov [#allocation6]  }
 0x19e   : > { %p4849_p8 = scmp.ne.s32.totalorder %s5476_s16, %s4848_s15  ;;  %s4853_s25 = sshll.u32 %s4995_s2, 4  ;;  %s4854_s25 = int_to_ptr.vmem [resolvable:$false] %s4853_s25 }
 0x19f   : > { %s4855_s24 = scalar_lea.vmem %s4854_s25, 512  ;;  %p4856_p13 = scmp.lt.s32.totalorder %s5476_s16, %s4854_s25 }
 0x1a0   : > { %p4851_p7 = pnand %p4849_p8, %p4835_p5  ;;  %p4857_p9 = scmp.lt.s32.totalorder %s4855_s24, %s4848_s15 }
 0x1a2   : > { %p4852_p3 = pneg %p4851_p7  ;;  %p4858_p6 = por %p4857_p9, %p4856_p13 }
 0x1a4   : > { %p4859_p11 = pnand %p4858_p6, %p4852_p3 }
 0x1a6   : > { %4862 = shalt.err (!%p4859_p11)
}
 0x1a7   : > { %s5910_s30 = smov 8   ;;  %s5911_s29 = smov 128  }
 0x1a8   : > { %4310 = dma.hbm_to_vmem [thread:$0]  (!%p5472_p2), %s5468_s18, 256, %s5476_s16, %s5478_s17, %s5911_s29, %s5911_s29, %s5910_s30  }
 0x1a9   : > { %s5912_s27 = sld [smem:[#allocation47_spill]] }
 0x1af   : > { %p5913_p5 = scmp.ne.s32.totalorder %s5912_s27, 0 }
 0x1b0   : > { %s5914_s21 = sld [smem:[#allocation43_spill]] (!%p5913_p5) }
 0x1b1   : > { %604 = sbr.rel (%p5913_p5) target bundleno = 2830 (0xb0e), region = 80 }
 0x1b6   : > { %s5512_s2 = sand.u32 (!%p5913_p5), 1, %s5914_s21  }
 0x1b7   : > { %s5865_s15 = sshll.u32 (!%p5913_p5), %s5512_s2, 4  ;;  %s607_s25 = scalar_lea.sflag (!%p5913_p5), [#allocation7], %s5512_s2 }
 0x1b8   : > { %s5518_s1 = scalar_lea.vmem [#allocation6], %s5865_s15 }
 0x1b9   : > { %4916 = dma.done.wait (%p5447_p4), %s607_s25, 256  }
 0x1ba   : > { %4918 = vsyncadd (%p5447_p4), %s607_s25, 4294967040  ;;  %s5915_s18 = sld [smem:[#allocation46_spill]] }
 0x1c0   : > { %p5916_p13 = scmp.ne.s32.totalorder %s5915_s18, 0 }
 0x1c2   : > { %4920 = dma.done.wait (%p5916_p13), [#allocation9], 64  }
 0x1c3   : > { %4922 = vsyncadd (%p5916_p13), [#allocation9], 4294967232 }
 0x1c4   : > { %4924 = dma.done.wait (%p5916_p13), [#allocation12], 32  }
 0x1c5   : > { %4926 = vsyncadd (%p5916_p13), [#allocation12], 4294967264 }
 0x1c6   : > { %4928 = dma.done.wait (%p5916_p13), [#allocation15], 4096  }
 0x1c7   : > { %4930 = vsyncadd (%p5916_p13), [#allocation15], 4294963200 }
 0x1c8   : > { %4932 = dma.done.wait (%p5916_p13), [#allocation18], 2560  }
 0x1c9   : > { %4934 = vsyncadd (%p5916_p13), [#allocation18], 4294964736 }
 0x1ca   : > { %4936 = dma.done.wait (%p5916_p13), [#allocation21], 32  }
 0x1cb   : > { %4938 = vsyncadd (%p5916_p13), [#allocation21], 4294967264 }
 0x1cc   : > { %4940 = dma.done.wait (%p5916_p13), [#allocation24], 528  }
 0x1cd   : > { %4942 = vsyncadd (%p5916_p13), [#allocation24], 4294966768 }
 0x1ce   : > { %4944 = dma.done.wait (%p5916_p13), [#allocation27], 2064  }
 0x1cf   : > { %4946 = vsyncadd (%p5916_p13), [#allocation27], 4294965232 }
 0x1d0   : > { %4948 = dma.done.wait (%p5916_p13), [#allocation30], 16  }
 0x1d1   : > { %4950 = vsyncadd (%p5916_p13), [#allocation30], 4294967280 }
 0x1d2   : > { %671 = sfence }
 0x1d3   : > { %v719_v0 = vld [vmem:[%s5518_s1] sm:$0xff]  ;;  %vm723_vm0 = vcmask 261120   ;;  %v720_v1 = vld [vmem:[%s5518_s1 + $0x8] sm:$0xff]  ;;  %vm854_vm1 = vcmask 64512   ;;  %vm1619_vm3 = vcmask 130048   ;;  %s5669_s4 = sld [smem:[#allocation10 + $0x80]] }
 0x1d4   : > { %v724_v2 = vsel %vm723_vm0, %v719_v0, 0.0  ;;  %v727_v3 = vsel %vm723_vm0, %v720_v1, 0.0  ;;  %v769_v14 = vld [vmem:[#allocation16] sm:$0xff]  ;;  %v770_v15 = vld [vmem:[#allocation16 + $0x8] sm:$0xff]  ;;  %v771_v20 = vld [vmem:[#allocation16 + $0x10] sm:$0xff]  ;;  %s5671_s16 = sld [smem:[#allocation10]] }
 0x1d5   : > { %725 = vadd.xlane.f32.xlu0 %v724_v2  ;;  %v1105_v16 = vld [vmem:[#allocation16 + $0x40] sm:$0xff]  ;;  %v4022_v17 = vpack.c.bf16 %v770_v15, %v769_v14  ;;  %v1106_v18 = vld [vmem:[#allocation16 + $0x48] sm:$0xff]  ;;  %v772_v21 = vld [vmem:[#allocation16 + $0x18] sm:$0xff]  ;;  %s5673_s17 = sld [smem:[#allocation10 + $0x100]]  ;;  %s5677_s30 = sld [smem:[#allocation10 + $0x81]] }
 0x1d6   : > { %v4054_v19 = vpack.c.bf16 %v1106_v18, %v1105_v16  ;;  %v1107_v22 = vld [vmem:[#allocation16 + $0x50] sm:$0xff]  ;;  %v4026_v23 = vpack.c.bf16 %v772_v21, %v771_v20  ;;  %v1108_v24 = vld [vmem:[#allocation16 + $0x58] sm:$0xff]  ;;  %v857_v26 = vld [vmem:[#allocation17] sm:$0xff]  ;;  %s5675_s24 = sld [smem:[#allocation10 + $0x180]]  ;;  %s5679_s29 = sld [smem:[#allocation10 + $0x1]] }
 0x1d7   : > { %4023 = vmatprep.subr.bf16.mxu1 %v4022_v17  ;;  %v4058_v25 = vpack.c.bf16 %v1108_v24, %v1107_v22  ;;  %v858_v27 = vld [vmem:[#allocation17 + $0x8] sm:$0xff]  ;;  %v1271_v28 = vld [vmem:[#allocation16 + $0x60] sm:$0xff]  ;;  %v3541_v39 = vld [vmem:[#allocation11] ss:$0 sm:$0xff]  ;;  %s5681_s27 = sld [smem:[#allocation10 + $0x101]]  ;;  %s5686_s25 = sld [smem:[#allocation10 + $0x82]] }
 0x1d8   : > { %4055 = vmatprep.subr.bf16.mxu0 %v4054_v19  ;;  %4025 = vmatpush3.bf16.msra.mxu1 %v4022_v17  ;;  %v4030_v29 = vpack.c.bf16 %v858_v27, %v857_v26  ;;  %v1272_v30 = vld [vmem:[#allocation16 + $0x68] sm:$0xff]  ;;  %v3542_v41 = vld [vmem:[#allocation13] ss:$0 sm:$0xff]  ;;  %v859_v46 = vld [vmem:[#allocation17 + $0x10] sm:$0xff]  ;;  %s5683_s21 = sld [smem:[#allocation10 + $0x181]]  ;;  %s5688_s18 = sld [smem:[#allocation10 + $0x2]] }
 0x1d9   : > { %728 = vadd.xlane.f32.xlu0 %v727_v3  ;;  %4057 = vmatpush3.bf16.msra.mxu0 %v4054_v19  ;;  %v4070_v31 = vpack.c.bf16 %v1272_v30, %v1271_v28  ;;  %v860_v48 = vld [vmem:[#allocation17 + $0x18] sm:$0xff]  ;;  %v1273_v49 = vld [vmem:[#allocation16 + $0x70] sm:$0xff]  ;;  %v939_v52 = vld [vmem:[#allocation16 + $0x20] sm:$0xff]  ;;  %s5691_s15 = sld [smem:[#allocation10 + $0x102]]  ;;  %s5695_s5 = sld [smem:[#allocation10 + $0x83]] }
 0x1da   : > { %4027 = vmatprep.subr.bf16.mxu1 %v4026_v23  ;;  %4059 = vmatprep.subr.bf16.mxu0 %v4058_v25  ;;  %v1274_v50 = vld [vmem:[#allocation16 + $0x78] sm:$0xff]  ;;  %v4034_v53 = vpack.c.bf16 %v860_v48, %v859_v46  ;;  %v940_v55 = vld [vmem:[#allocation16 + $0x28] sm:$0xff]  ;;  %v1443_v56 = vld [vmem:[#allocation14] sm:$0xff]  ;;  %s5693_s3 = sld [smem:[#allocation10 + $0x182]]  ;;  %s5697_s6 = sld [smem:[#allocation10 + $0x3]] }
 0x1db   : > { %v4074_v54 = vpack.c.bf16 %v1274_v50, %v1273_v49  ;;  %v1444_v57 = vld [vmem:[#allocation14 + $0x8] sm:$0xff]  ;;  %v4038_v58 = vpack.c.bf16 %v940_v55, %v939_v52  ;;  %v941_v60 = vld [vmem:[#allocation16 + $0x30] sm:$0xff]  ;;  %v942_v61 = vld [vmem:[#allocation16 + $0x38] sm:$0xff]  ;;  %s5699_s7 = sld [smem:[#allocation10 + $0x103]]  ;;  %p5922_p3 = scmp.ne.s32.totalorder %s5905_s0, 0 }
 0x1dc   : > { %4029 = vmatpush3.bf16.msra.mxu1 %v4026_v23  ;;  %v4086_v59 = vpack.c.bf16 %v1444_v57, %v1443_v56  ;;  %v1445_v62 = vld [vmem:[#allocation14 + $0x10] sm:$0xff]  ;;  %v1446_v63 = vld [vmem:[#allocation14 + $0x18] sm:$0xff]  ;;  %v1022_v2 = vld [vmem:[#allocation17 + $0x20] sm:$0xff]  ;;  %s5701_s8 = sld [smem:[#allocation10 + $0x183]] }
 0x1dd   : > { %4061 = vmatpush3.bf16.msra.mxu0 %v4058_v25  ;;  %4031 = vmatprep.subr.bf16.mxu1 %v4030_v29  ;;  %v1023_v3 = vld [vmem:[#allocation17 + $0x28] sm:$0xff]  ;;  %v1188_v14 = vld [vmem:[#allocation17 + $0x40] sm:$0xff]  ;;  %v1190_v22 = vld [vmem:[#allocation17 + $0x50] sm:$0xff] }
 0x1de   : > { %4071 = vmatprep.subr.bf16.mxu0 %v4070_v31  ;;  %v1189_v15 = vld [vmem:[#allocation17 + $0x48] sm:$0xff]  ;;  %v1796_v18 = vld [vmem:[#allocation14 + $0x40] sm:$0xff]  ;;  %v1191_v23 = vld [vmem:[#allocation17 + $0x58] sm:$0xff] }
 0x1df   : > { %v1797_v19 = vld [vmem:[#allocation14 + $0x48] sm:$0xff]  ;;  %v4062_v20 = vpack.c.bf16 %v1189_v15, %v1188_v14  ;;  %v1798_v24 = vld [vmem:[#allocation14 + $0x50] sm:$0xff]  ;;  %v1799_v25 = vld [vmem:[#allocation14 + $0x58] sm:$0xff]  ;;  %v4066_v26 = vpack.c.bf16 %v1191_v23, %v1190_v22 }
 0x1e0   : > { %v4114_v21 = vpack.c.bf16 %v1797_v19, %v1796_v18  ;;  %v1354_v27 = vld [vmem:[#allocation17 + $0x60] sm:$0xff]  ;;  %v1355_v28 = vld [vmem:[#allocation17 + $0x68] sm:$0xff]  ;;  %vm5624_vm2 = vmpackc.low %vm854_vm1, %vm854_vm1 }
 0x1e1   : > { %v1969_v30 = vld [vmem:[#allocation14 + $0x60] sm:$0xff] }
 0x262   : > { %v726_v4 = vpop.xlane.xlu0 %725 }
 0x263   : > { %v731_v5 = vmul.f32 0.03125, %v726_v4  ;;  %v1623_v4 = vld [vmem:[#allocation14 + $0x20] sm:$0xff] }
 0x265   : > { %v733_v6 = vsub.f32 %v719_v0, %v731_v5  ;;  %v4042_v0 = vpack.c.bf16 %v942_v61, %v941_v60  ;;  %v1624_v5 = vld [vmem:[#allocation14 + $0x28] sm:$0xff] }
 0x266   : > { %v729_v7 = vpop.xlane.xlu0 %728 }
 0x267   : > { %v732_v8 = vmul.f32 0.03125, %v729_v7  ;;  %v735_v9 = vmul.f32 %v733_v6, %v733_v6  ;;  %v4046_v7 = vpack.c.bf16 %v1023_v3, %v1022_v2 }
 0x269   : > { %v734_v10 = vsub.f32 %v720_v1, %v732_v8  ;;  %v737_v11 = vsel %vm723_vm0, %v735_v9, 0.0  ;;  %v4090_v1 = vpack.c.bf16 %v1446_v63, %v1445_v62  ;;  %v4100_v8 = vpack.c.bf16 %v1624_v5, %v1623_v4  ;;  %v1024_v9 = vld [vmem:[#allocation17 + $0x30] sm:$0xff] }
 0x26a   : > { %738 = vadd.xlane.f32.xlu1 %v737_v11  ;;  %v1625_v11 = vld [vmem:[#allocation14 + $0x30] sm:$0xff] }
 0x26b   : > { %v736_v12 = vmul.f32 %v734_v10, %v734_v10 }
 0x26d   : > { %v740_v13 = vsel %vm723_vm0, %v736_v12, 0.0  ;;  %v1626_v12 = vld [vmem:[#allocation14 + $0x38] sm:$0xff] }
 0x26e   : > { %741 = vadd.xlane.f32.xlu1 %v740_v13  ;;  %v4104_v17 = vpack.c.bf16 %v1626_v12, %v1625_v11 }
 0x2f7   : > { %v739_v32 = vpop.xlane.xlu1 %738 }
 0x2f8   : > { %v743_v33 = vmul.f32 0.03125, %v739_v32  ;;  %v4078_v32 = vpack.c.bf16 %v1355_v28, %v1354_v27 }
 0x2fa   : > { %v745_v34 = vadd.f32 1e-05, %v743_v33 }
 0x2fb   : > { %v742_v35 = vpop.xlane.xlu1 %741 }
 0x2fc   : > { %4411 = vrsqrt.f32 %v745_v34  ;;  %v744_v36 = vmul.f32 0.03125, %v742_v35  ;;  %v1356_v34 = vld [vmem:[#allocation17 + $0x70] sm:$0xff]  ;;  %v1357_v35 = vld [vmem:[#allocation17 + $0x78] sm:$0xff] }
 0x2fe   : > { %v746_v37 = vadd.f32 1e-05, %v744_v36  ;;  %v1971_v36 = vld [vmem:[#allocation14 + $0x70] sm:$0xff] }
 0x300   : > { %4413 = vrsqrt.f32 %v746_v37  ;;  %v1972_v37 = vld [vmem:[#allocation14 + $0x78] sm:$0xff] }
 0x306   : > { %v4412_v38 = vpop.eup %4411 }
 0x307   : > { %v749_v40 = vmul.f32 %v4412_v38, %v733_v6  ;;  %v4082_v38 = vpack.c.bf16 %v1357_v35, %v1356_v34  ;;  %v2144_v34 = vstv %s5671_s16  ;;  %v2150_v35 = vstv %s5679_s29 }
 0x309   : > { %v757_v42 = vmul.f32 %v3541_v39, %v749_v40 }
 0x30a   : > { %v4414_v43 = vpop.eup %4413 }
 0x30b   : > { %v5562_v44 = vadd.f32 %v3542_v41, %v757_v42  ;;  %v750_v45 = vmul.f32 %v4414_v43, %v734_v10  ;;  %v1025_v10 = vld [vmem:[#allocation17 + $0x38] sm:$0xff] }
 0x30c   : > { %v4050_v13 = vpack.c.bf16 %v1025_v10, %v1024_v9 }
 0x30d   : > { %767 = vst.msk [vmem:[#allocation2] sm:$0xff] %vm723_vm0, %v5562_v44  ;;  %v758_v47 = vmul.f32 %v3541_v39, %v750_v45  ;;  %3776 = vmatprep.mubr.msk.f32.mxu1 %vm723_vm0, %v5562_v44  ;;  %3820 = vmatprep.mubr.msk.f32.mxu0 %vm723_vm0, %v5562_v44  ;;  %v4132_v39 = vpack.c.bf16 %v1972_v37, %v1971_v36  ;;  %v2570_v36 = vstv %s5673_s17  ;;  %v2783_v37 = vstv %s5675_s24  ;;  %s3264_s17 = scalar_lea.sflag [#allocation8], %s5512_s2 }
 0x30f   : > { %v5570_v51 = vadd.f32 %v3542_v41, %v758_v47 }
 0x311   : > { %768 = vst.msk [vmem:[#allocation2 + $0x8] sm:$0xff] %vm723_vm0, %v5570_v51  ;;  %3777 = vmatmul.mubr.msk.f32.vlgmr.msra.gmra.mrb[0].mxu1 %vm723_vm0, %v5570_v51  ;;  %3821 = vmatmul.mubr.msk.f32.vlgmr.msra.gmra.mrb[0].mxu0 %vm723_vm0, %v5570_v51 }
 0x312   : > { %4033 = vmatpush3.bf16.msra.mxu1 %v4030_v29  ;;  %4073 = vmatpush3.bf16.msra.mxu0 %v4070_v31  ;;  %v4118_v29 = vpack.c.bf16 %v1799_v25, %v1798_v24  ;;  %v1970_v31 = vld [vmem:[#allocation14 + $0x68] sm:$0xff] }
 0x313   : > { %3787 = vmatprep.mubr.msk.f32.mxu1 %vm723_vm0, %v5562_v44  ;;  %3842 = vmatprep.mubr.msk.f32.mxu0 %vm723_vm0, %v5562_v44  ;;  %v4128_v33 = vpack.c.bf16 %v1970_v31, %v1969_v30  ;;  %v2278_v30 = vstv %s5669_s4  ;;  %v2282_v31 = vstv %s5677_s30  ;;  %s5921_s4 = sld [smem:[#allocation57_spill]]  ;;  %s4996_s30 = smov [#allocation31]  }
 0x314   : > { %4035 = vmatprep.subr.bf16.mxu1 %v4034_v53  ;;  %4075 = vmatprep.subr.bf16.mxu0 %v4074_v54  ;;  %v5588_v6 = vld [vmem:[#allocation2] sm:$0xff]  ;;  %s4867_s29 = sshll.u32 %s4996_s30, 4  ;;  %s4868_s29 = int_to_ptr.vmem [resolvable:$false] %s4867_s29 }
 0x316   : > { %4037 = vmatpush3.bf16.msra.mxu1 %v4034_v53  ;;  %4077 = vmatpush3.bf16.msra.mxu0 %v4074_v54 }
 0x317   : > { %4039 = vmatprep.subr.bf16.mxu1 %v4038_v58  ;;  %4087 = vmatprep.subr.bf16.mxu0 %v4086_v59 }
 0x318   : > { %v1442_v16 = vld [vmem:[#allocation2 + $0x8] sm:$0xff] }
 0x319   : > { %3788 = vmatmul.mubr.msk.f32.vlgmr.msra.gmra.mrb[2].mxu1 %vm723_vm0, %v5570_v51  ;;  %3843 = vmatmul.mubr.msk.f32.vlgmr.msra.gmra.mrb[2].mxu0 %vm723_vm0, %v5570_v51 }
 0x31a   : > { %4041 = vmatpush3.bf16.msra.mxu1 %v4038_v58  ;;  %3798 = vmatprep.mubr.msk.f32.mxu1 %vm723_vm0, %v5562_v44 }
 0x31b   : > { %4089 = vmatpush3.bf16.msra.mxu0 %v4086_v59  ;;  %3864 = vmatprep.mubr.msk.f32.mxu0 %vm723_vm0, %v5588_v6 }
 0x31c   : > { %4043 = vmatprep.subr.bf16.mxu1 %v4042_v0  ;;  %4091 = vmatprep.subr.bf16.mxu0 %v4090_v1 }
 0x31e   : > { %4045 = vmatpush3.bf16.msra.mxu1 %v4042_v0 }
 0x31f   : > { %4093 = vmatpush3.bf16.msra.mxu0 %v4090_v1  ;;  %4047 = vmatprep.subr.bf16.mxu1 %v4046_v7 }
 0x320   : > { %4101 = vmatprep.subr.bf16.mxu0 %v4100_v8 }
 0x321   : > { %3799 = vmatmul.mubr.msk.f32.vlgmr.msra.gmra.mrb[4].mxu1 %vm723_vm0, %v5570_v51 }
 0x322   : > { %3865 = vmatmul.mubr.msk.f32.vlgmr.msra.gmra.mrb[4].mxu0 %vm723_vm0, %v1442_v16  ;;  %4049 = vmatpush3.bf16.msra.mxu1 %v4046_v7 }
 0x323   : > { %3809 = vmatprep.mubr.msk.f32.mxu1 %vm723_vm0, %v5562_v44  ;;  %4103 = vmatpush3.bf16.msra.mxu0 %v4100_v8 }
 0x324   : > { %3882 = vmatprep.mubr.msk.f32.mxu0 %vm723_vm0, %v5588_v6  ;;  %4051 = vmatprep.subr.bf16.mxu1 %v4050_v13 }
 0x325   : > { %4105 = vmatprep.subr.bf16.mxu0 %v4104_v17 }
 0x326   : > { %4053 = vmatpush3.bf16.msra.mxu1 %v4050_v13 }
 0x327   : > { %4107 = vmatpush3.bf16.msra.mxu0 %v4104_v17  ;;  %4063 = vmatprep.subr.bf16.mxu1 %v4062_v20 }
 0x328   : > { %4115 = vmatprep.subr.bf16.mxu0 %v4114_v21 }
 0x329   : > { %3810 = vmatmul.mubr.msk.f32.vlgmr.msra.gmra.mrb[6].mxu1 %vm723_vm0, %v5570_v51 }
 0x32a   : > { %3883 = vmatmul.mubr.msk.f32.vlgmr.msra.gmra.mrb[6].mxu0 %vm723_vm0, %v1442_v16  ;;  %4065 = vmatpush3.bf16.msra.mxu1 %v4062_v20 }
 0x32b   : > { %3831 = vmatprep.mubr.msk.f32.mxu1 %vm723_vm0, %v5562_v44  ;;  %4117 = vmatpush3.bf16.msra.mxu0 %v4114_v21 }
 0x32c   : > { %3900 = vmatprep.mubr.msk.f32.mxu0 %vm723_vm0, %v5588_v6  ;;  %4067 = vmatprep.subr.bf16.mxu1 %v4066_v26 }
 0x32d   : > { %4119 = vmatprep.subr.bf16.mxu0 %v4118_v29 }
 0x32e   : > { %4069 = vmatpush3.bf16.msra.mxu1 %v4066_v26 }
 0x32f   : > { %4121 = vmatpush3.bf16.msra.mxu0 %v4118_v29  ;;  %4079 = vmatprep.subr.bf16.mxu1 %v4078_v32 }
 0x330   : > { %4129 = vmatprep.subr.bf16.mxu0 %v4128_v33 }
 0x331   : > { %3832 = vmatmul.mubr.msk.f32.vlgmr.msra.gmra.mrb[8].mxu1 %vm723_vm0, %v5570_v51 }
 0x332   : > { %3901 = vmatmul.mubr.msk.f32.vlgmr.msra.gmra.mrb[8].mxu0 %vm723_vm0, %v1442_v16  ;;  %4081 = vmatpush3.bf16.msra.mxu1 %v4078_v32 }
 0x333   : > { %3853 = vmatprep.mubr.msk.f32.mxu1 %vm723_vm0, %v5562_v44  ;;  %4131 = vmatpush3.bf16.msra.mxu0 %v4128_v33 }
 0x334   : > { %3918 = vmatprep.mubr.msk.f32.mxu0 %vm723_vm0, %v5588_v6  ;;  %4083 = vmatprep.subr.bf16.mxu1 %v4082_v38 }
 0x335   : > { %4133 = vmatprep.subr.bf16.mxu0 %v4132_v39 }
 0x336   : > { %4085 = vmatpush3.bf16.msra.mxu1 %v4082_v38 }
 0x337   : > { %4135 = vmatpush3.bf16.msra.mxu0 %v4132_v39 }
 0x339   : > { %3854 = vmatmul.mubr.msk.f32.vlgmr.msra.gmra.mrb[10].mxu1 %vm723_vm0, %v5570_v51 }
 0x33a   : > { %3919 = vmatmul.mubr.msk.f32.vlgmr.msra.gmra.mrb[10].mxu0 %vm723_vm0, %v1442_v16 }
 0x3e4   : > { %v3778_v40 = vpop.f32.mrb[0].mxu1  ;;  %v3822_v41 = vpop.f32.mrb[0].mxu0 }
 0x3e5   : > { %856 = vst.msk [vmem:[#allocation3 + $0x8] sm:$0xff] %vm854_vm1, %v3778_v40  ;;  %1186 = vst.msk [vmem:[#allocation3 + $0x28] sm:$0xff] %vm854_vm1, %v3822_v41  ;;  %v845_v42 = vpop.f32.mrb[1].mxu1  ;;  %v1175_v43 = vpop.f32.mrb[1].mxu0  ;;  %v2288_v40 = vstv %s5686_s25  ;;  %v2158_v41 = vstv %s5688_s18 }
 0x3e6   : > { %855 = vst.msk [vmem:[#allocation3] sm:$0xff] %vm854_vm1, %v845_v42  ;;  %1185 = vst.msk [vmem:[#allocation3 + $0x20] sm:$0xff] %vm854_vm1, %v1175_v43  ;;  %v2574_v42 = vstv %s5681_s27  ;;  %v2787_v43 = vstv %s5683_s21  ;;  %s4869_s27 = scalar_lea.vmem %s4868_s29, 512 }
 0x3ec   : > { %v3789_v44 = vpop.f32.mrb[2].mxu1  ;;  %v3844_v45 = vpop.f32.mrb[2].mxu0  ;;  %v1530_v46 = vld [vmem:[#allocation3 + $0x8] sm:$0xff] }
 0x3ed   : > { %937 = vst.msk [vmem:[#allocation4 + $0x8] sm:$0xff] %vm854_vm1, %v3789_v44  ;;  %1352 = vst.msk [vmem:[#allocation3 + $0x38] sm:$0xff] %vm854_vm1, %v3844_v45  ;;  %v927_v47 = vpop.f32.mrb[3].mxu1  ;;  %v1341_v48 = vpop.f32.mrb[3].mxu0  ;;  %v1529_v49 = vld [vmem:[#allocation3] sm:$0xff]  ;;  %v1877_v1 = vld [vmem:[#allocation3 + $0x28] sm:$0xff]  ;;  %v2294_v45 = vstv %s5695_s5 }
 0x3ee   : > { %936 = vst.msk [vmem:[#allocation4] sm:$0xff] %vm854_vm1, %v927_v47  ;;  %1351 = vst.msk [vmem:[#allocation3 + $0x30] sm:$0xff] %vm854_vm1, %v1341_v48  ;;  %v4094_v51 = vpack.c.bf16 %v1530_v46, %v1529_v49  ;;  %v1876_v0 = vld [vmem:[#allocation3 + $0x20] sm:$0xff]  ;;  %v2580_v48 = vstv %s5691_s15  ;;  %v2793_v49 = vstv %s5693_s3  ;;  %s5919_s3 = sld [smem:[#allocation45_spill]]  ;;  %s5920_s5 = sshll.u32 %s5512_s2, 4 }
 0x3ef   : > { %v4122_v4 = vpack.c.bf16 %v1877_v1, %v1876_v0 }
 0x3f0   : > { %4096 = vmatprep.subr.msk.bf16.mxu1 %vm5624_vm2, %v4094_v51 }
 0x3f1   : > { %4099 = vmatpush3.bf16.xpose.msk.msra.mxu1 %vm5624_vm2, %v4094_v51  ;;  %v2166_v51 = vstv %s5697_s6  ;;  %s713_s6 = scalar_lea.vmem [#allocation31], %s5920_s5 }
 0x3f4   : > { %v3800_v52 = vpop.f32.mrb[4].mxu1  ;;  %v2194_v53 = vld [vmem:[#allocation4 + $0x8] sm:$0xff]  ;;  %v2050_v9 = vld [vmem:[#allocation3 + $0x38] sm:$0xff] }
 0x3f5   : > { %1020 = vst.msk [vmem:[#allocation3 + $0x18] sm:$0xff] %vm854_vm1, %v3800_v52  ;;  %v3866_v54 = vpop.f32.mrb[4].mxu0  ;;  %v1009_v55 = vpop.f32.mrb[5].mxu1  ;;  %v2193_v56 = vld [vmem:[#allocation4] sm:$0xff]  ;;  %v2049_v8 = vld [vmem:[#allocation3 + $0x30] sm:$0xff]  ;;  %v2586_v52 = vstv %s5699_s7  ;;  %s3279_s7 = sshll.u32 %s713_s6, 4  ;;  %s5783_s7 = int_to_ptr.vmem [resolvable:$true] %s3279_s7 }
 0x3f6   : > { %1019 = vst.msk [vmem:[#allocation3 + $0x10] sm:$0xff] %vm854_vm1, %v1009_v55  ;;  %v1520_v57 = vpop.f32.mrb[5].mxu0  ;;  %v4142_v58 = vpack.c.bf16 %v2194_v53, %v2193_v56  ;;  %v4136_v11 = vpack.c.bf16 %v2050_v9, %v2049_v8  ;;  %v2799_v53 = vstv %s5701_s8  ;;  %s3627_s8 = sshll.u32 %s5919_s3, 8  ;;  %s4863_s24 = scalar_lea.vmem %s5783_s7, 256 }
 0x3f7   : > { %3871 = vmatprep.mubr.msk.f32.mxu1 %vm854_vm1, %v1520_v57  ;;  %s5781_s16 = scalar_lea.hbm %s5921_s4, %s3627_s8  ;;  %p4864_p4 = scmp.ne.s32.totalorder %s5783_s7, %s4863_s24 }
 0x3f8   : > { %4143 = vmatprep.subr.bf16.mxu0 %v4142_v58  ;;  %3872 = vmatmul.mubr.msk.f32.vlgmr.msra.gmra.mrb[12].mxu1 %vm854_vm1, %v3866_v54  ;;  %p4870_p12 = scmp.lt.s32.totalorder %s5783_s7, %s4868_s29  ;;  %p4871_p0 = scmp.lt.s32.totalorder %s4869_s27, %s4863_s24 }
 0x3f9   : > { %4145 = vmatpush3.bf16.msra.mxu0 %v4142_v58  ;;  %p4865_p2 = pnand %p4864_p4, %p5922_p3 }
 0x3fa   : > { %p4872_p1 = por %p4871_p0, %p4870_p12 }
 0x3fb   : > { %p4866_p10 = pneg %p4865_p2 }
 0x3fc   : > { %v3811_v59 = vpop.f32.mrb[6].mxu1  ;;  %v1704_v60 = vld [vmem:[#allocation3 + $0x18] sm:$0xff] }
 0x3fd   : > { %1103 = vst.msk [vmem:[#allocation4 + $0x18] sm:$0xff] %vm854_vm1, %v3811_v59  ;;  %v3884_v61 = vpop.f32.mrb[6].mxu0  ;;  %v1092_v62 = vpop.f32.mrb[7].mxu1  ;;  %v1703_v63 = vld [vmem:[#allocation3 + $0x10] sm:$0xff]  ;;  %p4873_p8 = pnand %p4872_p1, %p4866_p10 }
 0x3fe   : > { %1102 = vst.msk [vmem:[#allocation4 + $0x10] sm:$0xff] %vm854_vm1, %v1092_v62  ;;  %v1693_v2 = vpop.f32.mrb[7].mxu0  ;;  %v4108_v3 = vpack.c.bf16 %v1704_v60, %v1703_v63 }
 0x3ff   : > { %3889 = vmatprep.mubr.msk.f32.mxu1 %vm854_vm1, %v1693_v2 }
 0x400   : > { %4110 = vmatprep.subr.msk.bf16.mxu1 %vm5624_vm2, %v4108_v3 }
 0x401   : > { %4113 = vmatpush3.bf16.xpose.msk.msra.mxu1 %vm5624_vm2, %v4108_v3 }
 0x402   : > { %4124 = vmatprep.subr.msk.bf16.mxu1 %vm5624_vm2, %v4122_v4 }
 0x404   : > { %v3833_v5 = vpop.f32.mrb[8].mxu1  ;;  %v2323_v16 = vld [vmem:[#allocation4 + $0x18] sm:$0xff] }
 0x405   : > { %1269 = vst.msk [vmem:[#allocation4 + $0x28] sm:$0xff] %vm854_vm1, %v3833_v5  ;;  %v3902_v6 = vpop.f32.mrb[8].mxu0  ;;  %v1258_v7 = vpop.f32.mrb[9].mxu1  ;;  %v2322_v15 = vld [vmem:[#allocation4 + $0x10] sm:$0xff] }
 0x406   : > { %1268 = vst.msk [vmem:[#allocation4 + $0x20] sm:$0xff] %vm854_vm1, %v1258_v7  ;;  %v1866_v10 = vpop.f32.mrb[9].mxu0  ;;  %v4146_v18 = vpack.c.bf16 %v2323_v16, %v2322_v15 }
 0x408   : > { %3890 = vmatmul.mubr.msk.f32.vlgmr.msra.gmra.mrb[14].mxu1 %vm854_vm1, %v3884_v61 }
 0x409   : > { %4127 = vmatpush3.bf16.xpose.msk.msra.mxu1 %vm5624_vm2, %v4122_v4  ;;  %3907 = vmatprep.mubr.msk.f32.mxu1 %vm854_vm1, %v1866_v10 }
 0x40a   : > { %4138 = vmatprep.subr.msk.bf16.mxu1 %vm5624_vm2, %v4136_v11 }
 0x40c   : > { %v3855_v12 = vpop.f32.mrb[10].mxu1  ;;  %v2615_v20 = vld [vmem:[#allocation4 + $0x28] sm:$0xff] }
 0x40d   : > { %1435 = vst.msk [vmem:[#allocation4 + $0x38] sm:$0xff] %vm854_vm1, %v3855_v12  ;;  %v3920_v13 = vpop.f32.mrb[10].mxu0  ;;  %v1424_v14 = vpop.f32.mrb[11].mxu1  ;;  %v2614_v19 = vld [vmem:[#allocation4 + $0x20] sm:$0xff] }
 0x40e   : > { %1434 = vst.msk [vmem:[#allocation4 + $0x30] sm:$0xff] %vm854_vm1, %v1424_v14  ;;  %v2039_v17 = vpop.f32.mrb[11].mxu0  ;;  %v5662_v21 = vpack.c.bf16 %v2615_v20, %v2614_v19 }
 0x410   : > { %3908 = vmatmul.mubr.msk.f32.vlgmr.msra.gmra.mrb[16].mxu1 %vm854_vm1, %v3902_v6 }
 0x411   : > { %4141 = vmatpush3.bf16.xpose.msk.msra.mxu1 %vm5624_vm2, %v4136_v11  ;;  %3925 = vmatprep.mubr.msk.f32.mxu1 %vm854_vm1, %v2039_v17 }
 0x412   : > { %4147 = vmatprep.subr.bf16.mxu1 %v4146_v18 }
 0x418   : > { %3926 = vmatmul.mubr.msk.f32.vlgmr.msra.gmra.mrb[18].mxu1 %vm854_vm1, %v3920_v13 }
 0x419   : > { %4149 = vmatpush3.bf16.msra.mxu1 %v4146_v18 }
 0x41a   : > { %4151 = vmatprep.subr.bf16.mxu1 %v5662_v21 }
 0x4cb   : > { %v3873_v22 = vpop.f32.mrb[12].mxu1 }
 0x4cc   : > { %1621 = vst.msk [vmem:[#allocation5 + $0x8] sm:$0xff] %vm1619_vm3, %v3873_v22  ;;  %v1610_v23 = vpop.f32.mrb[13].mxu1 }
 0x4cd   : > { %1620 = vst.msk [vmem:[#allocation5] sm:$0xff] %vm1619_vm3, %v1610_v23 }
 0x4d3   : > { %v2143_v38 = vld [vmem:[#allocation5 + $0x8] sm:$0xff] }
 0x4d4   : > { %v2142_v46 = vld [vmem:[#allocation5] sm:$0xff]  ;;  %v2280_v54 = vmul.f32 %v2278_v30, %v2143_v38  ;;  %v2146_v56 = vmul.f32 %v2144_v34, %v2143_v38  ;;  %v2572_v61 = vmul.f32 %v2570_v36, %v2143_v38 }
 0x4d5   : > { %v2279_v58 = vmul.f32 %v2278_v30, %v2142_v46  ;;  %v2145_v0 = vmul.f32 %v2144_v34, %v2142_v46  ;;  %v2571_v1 = vmul.f32 %v2570_v36, %v2142_v46 }
 0x4db   : > { %v3891_v24 = vpop.f32.mrb[14].mxu1 }
 0x4dc   : > { %1794 = vst.msk [vmem:[#allocation5 + $0x18] sm:$0xff] %vm1619_vm3, %v3891_v24  ;;  %v1783_v25 = vpop.f32.mrb[15].mxu1 }
 0x4dd   : > { %1793 = vst.msk [vmem:[#allocation5 + $0x10] sm:$0xff] %vm1619_vm3, %v1783_v25 }
 0x4e3   : > { %v3909_v26 = vpop.f32.mrb[16].mxu1  ;;  %v2149_v29 = vld [vmem:[#allocation5 + $0x18] sm:$0xff] }
 0x4e4   : > { %1967 = vst.msk [vmem:[#allocation5 + $0x28] sm:$0xff] %vm1619_vm3, %v3909_v26  ;;  %v1956_v27 = vpop.f32.mrb[17].mxu1  ;;  %v2148_v33 = vld [vmem:[#allocation5 + $0x10] sm:$0xff]  ;;  %v2284_v44 = vmul.f32 %v2282_v31, %v2149_v29  ;;  %v2152_v57 = vmul.f32 %v2150_v35, %v2149_v29  ;;  %v2576_v5 = vmul.f32 %v2574_v42, %v2149_v29  ;;  %v2789_v19 = vmul.f32 %v2787_v43, %v2149_v29 }
 0x4e5   : > { %1966 = vst.msk [vmem:[#allocation5 + $0x20] sm:$0xff] %vm1619_vm3, %v1956_v27  ;;  %v2283_v50 = vmul.f32 %v2282_v31, %v2148_v33  ;;  %v2151_v60 = vmul.f32 %v2150_v35, %v2148_v33  ;;  %v2575_v6 = vmul.f32 %v2574_v42, %v2148_v33  ;;  %v2788_v24 = vmul.f32 %v2787_v43, %v2148_v33 }
 0x4e6   : > { %v2286_v62 = vadd.f32 %v2284_v44, %v2280_v54  ;;  %v2154_v10 = vadd.f32 %v2152_v57, %v2146_v56  ;;  %v2578_v27 = vadd.f32 %v2576_v5, %v2572_v61  ;;  %v2785_v29 = vmul.f32 %v2783_v37, %v2143_v38 }
 0x4e7   : > { %v2285_v3 = vadd.f32 %v2283_v50, %v2279_v58  ;;  %v2153_v14 = vadd.f32 %v2151_v60, %v2145_v0 }
 0x4e8   : > { %v2791_v44 = vadd.f32 %v2789_v19, %v2785_v29 }
 0x4eb   : > { %v3927_v28 = vpop.f32.mrb[18].mxu1  ;;  %v2157_v39 = vld [vmem:[#allocation5 + $0x28] sm:$0xff] }
 0x4ec   : > { %2140 = vst.msk [vmem:[#allocation5 + $0x38] sm:$0xff] %vm1619_vm3, %v3927_v28  ;;  %v2129_v32 = vpop.f32.mrb[19].mxu1  ;;  %v2156_v47 = vld [vmem:[#allocation5 + $0x20] sm:$0xff]  ;;  %v2290_v55 = vmul.f32 %v2288_v40, %v2157_v39  ;;  %v2160_v63 = vmul.f32 %v2158_v41, %v2157_v39  ;;  %v2582_v18 = vmul.f32 %v2580_v48, %v2157_v39  ;;  %v2795_v36 = vmul.f32 %v2793_v49, %v2157_v39 }
 0x4ed   : > { %2139 = vst.msk [vmem:[#allocation5 + $0x30] sm:$0xff] %vm1619_vm3, %v2129_v32  ;;  %v2289_v59 = vmul.f32 %v2288_v40, %v2156_v47  ;;  %v2159_v4 = vmul.f32 %v2158_v41, %v2156_v47  ;;  %v2581_v23 = vmul.f32 %v2580_v48, %v2156_v47  ;;  %v2577_v32 = vadd.f32 %v2575_v6, %v2571_v1 }
 0x4ee   : > { %v2292_v7 = vadd.f32 %v2290_v55, %v2286_v62  ;;  %v2162_v17 = vadd.f32 %v2160_v63, %v2154_v10  ;;  %v2584_v35 = vadd.f32 %v2582_v18, %v2578_v27  ;;  %v2784_v41 = vmul.f32 %v2783_v37, %v2142_v46 }
 0x4ef   : > { %v2291_v12 = vadd.f32 %v2289_v59, %v2285_v3  ;;  %v2161_v22 = vadd.f32 %v2159_v4, %v2153_v14  ;;  %v2583_v40 = vadd.f32 %v2581_v23, %v2577_v32  ;;  %v2794_v33 = vmul.f32 %v2793_v49, %v2156_v47 }
 0x4f0   : > { %v2797_v54 = vadd.f32 %v2795_v36, %v2791_v44 }
 0x4f3   : > { %v2165_v2 = vld [vmem:[#allocation5 + $0x38] sm:$0xff] }
 0x4f4   : > { %v2296_v8 = vmul.f32 %v2294_v45, %v2165_v2  ;;  %v2164_v9 = vld [vmem:[#allocation5 + $0x30] sm:$0xff]  ;;  %v2168_v11 = vmul.f32 %v2166_v51, %v2165_v2  ;;  %v2588_v28 = vmul.f32 %v2586_v52, %v2165_v2 }
 0x4f5   : > { %v2295_v13 = vmul.f32 %v2294_v45, %v2164_v9  ;;  %v2167_v15 = vmul.f32 %v2166_v51, %v2164_v9  ;;  %v2587_v34 = vmul.f32 %v2586_v52, %v2164_v9  ;;  %v2801_v45 = vmul.f32 %v2799_v53, %v2165_v2 }
 0x4f6   : > { %v2298_v16 = vadd.f32 %v2296_v8, %v2292_v7  ;;  %v2170_v26 = vadd.f32 %v2168_v11, %v2162_v17  ;;  %v2590_v43 = vadd.f32 %v2588_v28, %v2584_v35  ;;  %v2790_v51 = vadd.f32 %v2788_v24, %v2784_v41 }
 0x4f7   : > { %v2297_v20 = vadd.f32 %v2295_v13, %v2291_v12  ;;  %v2169_v31 = vadd.f32 %v2167_v15, %v2161_v22  ;;  %v2589_v50 = vadd.f32 %v2587_v34, %v2583_v40  ;;  %v2800_v52 = vmul.f32 %v2799_v53, %v2164_v9  ;;  %v2406_v34 = vld [vmem:[#allocation19 + $0x8] sm:$0xff] }
 0x4f8   : > { %v2302_v25 = vsel %vm1619_vm3, %v2298_v16, -inf  ;;  %v2174_v42 = vsel %vm1619_vm3, %v2170_v26, -inf  ;;  %v2796_v55 = vadd.f32 %v2794_v33, %v2790_v51  ;;  %v2594_v38 = vsel %vm1619_vm3, %v2590_v43, -inf  ;;  %3942 = vmatprep.subr.mxu0 %v2406_v34  ;;  %v2828_v51 = vld [vmem:[#allocation4 + $0x38] sm:$0xff] }
 0x4f9   : > { %2303 = vmax.xlane.f32.xlu1 %v2302_v25  ;;  %v2299_v30 = vsel %vm1619_vm3, %v2297_v20, -inf  ;;  %v2171_v48 = vsel %vm1619_vm3, %v2169_v31, -inf  ;;  %v2803_v39 = vadd.f32 %v2801_v45, %v2797_v54  ;;  %v2591_v37 = vsel %vm1619_vm3, %v2589_v50, -inf }
 0x4fa   : > { %2300 = vmax.xlane.f32.xlu0 %v2299_v30  ;;  %v2802_v46 = vadd.f32 %v2800_v52, %v2796_v55 }
 0x4fb   : > { %v2807_v47 = vsel %vm1619_vm3, %v2803_v39, -inf }
 0x4fc   : > { %v2804_v49 = vsel %vm1619_vm3, %v2802_v46, -inf }
 0x4fd   : > { %2175 = vmax.xlane.f32.xlu1 %v2174_v42 }
 0x4fe   : > { %2172 = vmax.xlane.f32.xlu0 %v2171_v48 }
 0x501   : > { %2595 = vmax.xlane.f32.xlu1 %v2594_v38 }
 0x502   : > { %2592 = vmax.xlane.f32.xlu0 %v2591_v37 }
 0x505   : > { %2808 = vmax.xlane.f32.xlu1 %v2807_v47 }
 0x506   : > { %2805 = vmax.xlane.f32.xlu0 %v2804_v49 }
 0x586   : > { %v2304_v56 = vpop.xlane.xlu1 %2303 }
 0x587   : > { %v2306_v57 = vsub.f32 %v2298_v16, %v2304_v56  ;;  %v2301_v53 = vpop.xlane.xlu0 %2300 }
 0x588   : > { %v2305_v58 = vsub.f32 %v2297_v20, %v2301_v53 }
 0x589   : > { %v2309_v59 = vmul.f32 1.442695, %v2306_v57 }
 0x58a   : > { %v2307_v60 = vmul.f32 1.442695, %v2305_v58  ;;  %v2176_v61 = vpop.xlane.xlu1 %2175 }
 0x58b   : > { %4415 = vpow2.f32 %v2309_v59  ;;  %v2178_v62 = vsub.f32 %v2170_v26, %v2176_v61  ;;  %v2173_v63 = vpop.xlane.xlu0 %2172  ;;  %v2276_v59 = vld [vmem:[#allocation19] sm:$0xff] }
 0x58c   : > { %4417 = vpow2.f32 %v2307_v60  ;;  %v2177_v0 = vsub.f32 %v2169_v31, %v2173_v63 }
 0x58d   : > { %v2181_v1 = vmul.f32 1.442695, %v2178_v62  ;;  %v2698_v62 = vld [vmem:[#allocation19 + $0x10] sm:$0xff] }
 0x58e   : > { %v2179_v2 = vmul.f32 1.442695, %v2177_v0  ;;  %v2596_v3 = vpop.xlane.xlu1 %2595 }
 0x58f   : > { %4419 = vpow2.f32 %v2181_v1  ;;  %v2598_v4 = vsub.f32 %v2590_v43, %v2596_v3  ;;  %v2593_v5 = vpop.xlane.xlu0 %2592  ;;  %v2911_v3 = vld [vmem:[#allocation19 + $0x18] sm:$0xff] }
 0x590   : > { %4421 = vpow2.f32 %v2179_v2  ;;  %v2597_v6 = vsub.f32 %v2589_v50, %v2593_v5  ;;  %v2827_v50 = vld [vmem:[#allocation4 + $0x30] sm:$0xff] }
 0x591   : > { %v2601_v7 = vmul.f32 1.442695, %v2598_v4  ;;  %v4154_v38 = vpack.c.bf16 %v2828_v51, %v2827_v50  ;;  %v3615_v50 = vld [vmem:[#allocation22] ss:$0 sm:$0xff] }
 0x592   : > { %v2599_v8 = vmul.f32 1.442695, %v2597_v6  ;;  %v2809_v9 = vpop.xlane.xlu1 %2808  ;;  %v1438_v6 = vld [vmem:[%s5518_s1] sm:$0xff] }
 0x593   : > { %4423 = vpow2.f32 %v2601_v7  ;;  %v2811_v10 = vsub.f32 %v2803_v39, %v2809_v9  ;;  %v2806_v11 = vpop.xlane.xlu0 %2805  ;;  %v4455_v9 = vld [vmem:[%s5518_s1 + $0x8] sm:$0xff] }
 0x594   : > { %4425 = vpow2.f32 %v2599_v8  ;;  %v2810_v12 = vsub.f32 %v2802_v46, %v2806_v11  ;;  %v3614_v8 = vld [vmem:[#allocation20] ss:$0 sm:$0xff] }
 0x595   : > { %v4416_v13 = vpop.eup %4415  ;;  %v2814_v14 = vmul.f32 1.442695, %v2811_v10 }
 0x596   : > { %v4418_v15 = vpop.eup %4417  ;;  %v2812_v16 = vmul.f32 1.442695, %v2810_v12  ;;  %v2314_v17 = vsel %vm1619_vm3, %v4416_v13, 0.0 }
 0x597   : > { %4427 = vpow2.f32 %v2814_v14  ;;  %2315 = vadd.xlane.f32.xlu1 %v2314_v17  ;;  %v2311_v18 = vsel %vm1619_vm3, %v4418_v15, 0.0 }
 0x598   : > { %4429 = vpow2.f32 %v2812_v16  ;;  %2312 = vadd.xlane.f32.xlu0 %v2311_v18 }
 0x599   : > { %v4420_v19 = vpop.eup %4419 }
 0x59a   : > { %v4422_v20 = vpop.eup %4421  ;;  %v2186_v22 = vsel %vm1619_vm3, %v4420_v19, 0.0 }
 0x59b   : > { %2187 = vadd.xlane.f32.xlu1 %v2186_v22  ;;  %v2183_v23 = vsel %vm1619_vm3, %v4422_v20, 0.0 }
 0x59c   : > { %2184 = vadd.xlane.f32.xlu0 %v2183_v23 }
 0x59d   : > { %v4424_v24 = vpop.eup %4423 }
 0x59e   : > { %v4426_v25 = vpop.eup %4425  ;;  %v2606_v26 = vsel %vm1619_vm3, %v4424_v24, 0.0 }
 0x59f   : > { %2607 = vadd.xlane.f32.xlu1 %v2606_v26  ;;  %v2603_v27 = vsel %vm1619_vm3, %v4426_v25, 0.0 }
 0x5a0   : > { %2604 = vadd.xlane.f32.xlu0 %v2603_v27 }
 0x5a1   : > { %v4428_v28 = vpop.eup %4427 }
 0x5a2   : > { %v4430_v30 = vpop.eup %4429  ;;  %v2819_v31 = vsel %vm1619_vm3, %v4428_v28, 0.0 }
 0x5a3   : > { %2820 = vadd.xlane.f32.xlu1 %v2819_v31  ;;  %v2816_v32 = vsel %vm1619_vm3, %v4430_v30, 0.0 }
 0x5a4   : > { %2817 = vadd.xlane.f32.xlu0 %v2816_v32  ;;  %v3053_v32 = vld [vmem:[#allocation25 + $0x10] sm:$0xff] }
 0x624   : > { %v2316_v35 = vpop.xlane.xlu1 %2315 }
 0x625   : > { %4431 = vrcp.f32 %v2316_v35  ;;  %v2313_v29 = vpop.xlane.xlu0 %2312 }
 0x626   : > { %4433 = vrcp.f32 %v2313_v29  ;;  %v3161_v29 = vld [vmem:[#allocation28] sm:$0xff] }
 0x628   : > { %v2188_v36 = vpop.xlane.xlu1 %2187 }
 0x629   : > { %4435 = vrcp.f32 %v2188_v36  ;;  %v2185_v40 = vpop.xlane.xlu0 %2184  ;;  %v3162_v36 = vld [vmem:[#allocation28 + $0x8] sm:$0xff] }
 0x62a   : > { %4437 = vrcp.f32 %v2185_v40  ;;  %v4166_v40 = vpack.c.bf16 %v3162_v36, %v3161_v29  ;;  %v3620_v36 = vld [vmem:[#allocation29] ss:$0 sm:$0xff] }
 0x62c   : > { %v2608_v41 = vpop.xlane.xlu1 %2607 }
 0x62d   : > { %4439 = vrcp.f32 %v2608_v41  ;;  %v2605_v33 = vpop.xlane.xlu0 %2604 }
 0x62e   : > { %4441 = vrcp.f32 %v2605_v33 }
 0x62f   : > { %v4432_v42 = vpop.eup %4431 }
 0x630   : > { %v4434_v43 = vpop.eup %4433  ;;  %v2821_v44 = vpop.xlane.xlu1 %2820  ;;  %v2320_v52 = vmul.f32 %v4432_v42, %v4416_v13 }
 0x631   : > { %4443 = vrcp.f32 %v2821_v44  ;;  %v2818_v45 = vpop.xlane.xlu0 %2817  ;;  %v2319_v48 = vmul.f32 %v4434_v43, %v4418_v15 }
 0x632   : > { %4445 = vrcp.f32 %v2818_v45 }
 0x633   : > { %v4436_v54 = vpop.eup %4435  ;;  %3939 = vmatprep.mubr.msk.f32.mxu1 %vm1619_vm3, %v2319_v48 }
 0x634   : > { %v4438_v55 = vpop.eup %4437  ;;  %3940 = vmatmul.mubr.msk.f32.vlgmr.msra.gmra.mrb[20].mxu1 %vm1619_vm3, %v2320_v52  ;;  %v2192_v37 = vmul.f32 %v4436_v54, %v4420_v19 }
 0x635   : > { %4153 = vmatpush3.bf16.msra.mxu1 %v5662_v21  ;;  %v2191_v39 = vmul.f32 %v4438_v55, %v4422_v20  ;;  %v3616_v55 = vld [vmem:[#allocation23] ss:$0 sm:$0xff] }
 0x636   : > { %4155 = vmatprep.subr.bf16.mxu1 %v4154_v38 }
 0x637   : > { %v4440_v46 = vpop.eup %4439  ;;  %3932 = vmatprep.mubr.msk.f32.mxu0 %vm1619_vm3, %v2191_v39 }
 0x638   : > { %v4442_v47 = vpop.eup %4441  ;;  %3933 = vmatmul.mubr.msk.f32.vlgmr.msra.gmra.mrb[12].mxu0 %vm1619_vm3, %v2192_v37  ;;  %v2612_v56 = vmul.f32 %v4440_v46, %v4424_v24 }
 0x639   : > { %v2611_v49 = vmul.f32 %v4442_v47, %v4426_v25  ;;  %3943 = vmatpush3.msra.mxu0 %v2406_v34  ;;  %v3054_v34 = vld [vmem:[#allocation25 + $0x18] sm:$0xff] }
 0x63a   : > { %3947 = vmatprep.subr.mxu0 %v2276_v59  ;;  %v4162_v35 = vpack.c.bf16 %v3054_v34, %v3053_v32  ;;  %v3163_v47 = vld [vmem:[#allocation28 + $0x10] sm:$0xff] }
 0x63b   : > { %v4444_v57 = vpop.eup %4443  ;;  %3956 = vmatprep.mubr.msk.f32.mxu1 %vm1619_vm3, %v2611_v49  ;;  %v3164_v49 = vld [vmem:[#allocation28 + $0x18] sm:$0xff] }
 0x63c   : > { %v4446_v53 = vpop.eup %4445  ;;  %3957 = vmatmul.mubr.msk.f32.vlgmr.msra.gmra.mrb[22].mxu1 %vm1619_vm3, %v2612_v56  ;;  %v2825_v58 = vmul.f32 %v4444_v57, %v4428_v28  ;;  %v3051_v28 = vld [vmem:[#allocation25] sm:$0xff]  ;;  %v4170_v56 = vpack.c.bf16 %v3164_v49, %v3163_v47 }
 0x63d   : > { %4157 = vmatpush3.bf16.msra.mxu1 %v4154_v38  ;;  %v2824_v21 = vmul.f32 %v4446_v53, %v4430_v30  ;;  %v3052_v30 = vld [vmem:[#allocation25 + $0x8] sm:$0xff] }
 0x63e   : > { %v4158_v31 = vpack.c.bf16 %v3052_v30, %v3051_v28  ;;  %v3165_v57 = vld [vmem:[#allocation28 + $0x20] sm:$0xff]  ;;  %v3166_v53 = vld [vmem:[#allocation28 + $0x28] sm:$0xff] }
 0x63f   : > { %3968 = vmatprep.mubr.msk.f32.mxu1 %vm1619_vm3, %v2824_v21  ;;  %v4174_v21 = vpack.c.bf16 %v3166_v53, %v3165_v57 }
 0x640   : > { %3969 = vmatmul.mubr.msk.f32.vlgmr.msra.gmra.mrb[24].mxu1 %vm1619_vm3, %v2825_v58  ;;  %4159 = vmatprep.subr.bf16.mxu1 %v4158_v31  ;;  %v3167_v58 = vld [vmem:[#allocation28 + $0x30] sm:$0xff] }
 0x641   : > { %4161 = vmatpush3.bf16.msra.mxu1 %v4158_v31 }
 0x642   : > { %4163 = vmatprep.subr.bf16.mxu1 %v4162_v35 }
 0x645   : > { %4165 = vmatpush3.bf16.msra.mxu1 %v4162_v35 }
 0x707   : > { %v3941_v60 = vpop.f32.mrb[20].mxu1 }
 0x708   : > { %v2396_v61 = vpop.f32.mrb[21].mxu1 }
 0x709   : > { %3944 = vmatprep.mubr.msk.f32.mxu0 %vm854_vm1, %v2396_v61 }
 0x70a   : > { %3945 = vmatmul.mubr.msk.f32.vlgmr.msra.gmra.mrb[14].mxu0 %vm854_vm1, %v3941_v60  ;;  %v3169_v60 = vld [vmem:[#allocation28 + $0x40] sm:$0xff] }
 0x70b   : > { %3948 = vmatpush3.msra.mxu0 %v2276_v59  ;;  %v3934_v63 = vpop.f32.mrb[12].mxu0  ;;  %v3168_v59 = vld [vmem:[#allocation28 + $0x38] sm:$0xff] }
 0x70c   : > { %v2267_v0 = vpop.f32.mrb[13].mxu0  ;;  %3959 = vmatprep.subr.mxu0 %v2698_v62  ;;  %v4178_v61 = vpack.c.bf16 %v3168_v59, %v3167_v58 }
 0x70d   : > { %3949 = vmatprep.mubr.msk.f32.mxu0 %vm854_vm1, %v2267_v0  ;;  %v3171_v0 = vld [vmem:[#allocation28 + $0x50] sm:$0xff] }
 0x70f   : > { %v3958_v1 = vpop.f32.mrb[22].mxu1 }
 0x710   : > { %v2688_v2 = vpop.f32.mrb[23].mxu1 }
 0x712   : > { %3950 = vmatmul.mubr.msk.f32.vlgmr.msra.gmra.mrb[14].mxu0 %vm854_vm1, %v3934_v63 }
 0x713   : > { %3960 = vmatpush3.msra.mxu0 %v2698_v62  ;;  %3961 = vmatprep.mubr.msk.f32.mxu0 %vm854_vm1, %v2688_v2  ;;  %v3970_v4 = vpop.f32.mrb[24].mxu1  ;;  %v3170_v62 = vld [vmem:[#allocation28 + $0x48] sm:$0xff] }
 0x714   : > { %v2901_v5 = vpop.f32.mrb[25].mxu1  ;;  %3971 = vmatprep.subr.mxu0 %v2911_v3  ;;  %v4182_v63 = vpack.c.bf16 %v3170_v62, %v3169_v60 }
 0x71a   : > { %3962 = vmatmul.mubr.msk.f32.vlgmr.msra.gmra.mrb[14].mxu0 %vm854_vm1, %v3958_v1  ;;  %v3172_v1 = vld [vmem:[#allocation28 + $0x58] sm:$0xff] }
 0x71b   : > { %3972 = vmatpush3.msra.mxu0 %v2911_v3  ;;  %3973 = vmatprep.mubr.msk.f32.mxu0 %vm854_vm1, %v2901_v5  ;;  %v4186_v2 = vpack.c.bf16 %v3172_v1, %v3171_v0  ;;  %v3173_v3 = vld [vmem:[#allocation28 + $0x60] sm:$0xff] }
 0x71c   : > { %4167 = vmatprep.subr.bf16.mxu0 %v4166_v40 }
 0x722   : > { %3974 = vmatmul.mubr.msk.f32.vlgmr.msra.gmra.mrb[14].mxu0 %vm854_vm1, %v3970_v4  ;;  %v3174_v4 = vld [vmem:[#allocation28 + $0x68] sm:$0xff] }
 0x723   : > { %4169 = vmatpush3.bf16.msra.mxu0 %v4166_v40  ;;  %v4190_v5 = vpack.c.bf16 %v3174_v4, %v3173_v3 }
 0x724   : > { %4171 = vmatprep.subr.bf16.mxu0 %v4170_v56 }
 0x727   : > { %4173 = vmatpush3.bf16.msra.mxu0 %v4170_v56 }
 0x728   : > { %4175 = vmatprep.subr.bf16.mxu0 %v4174_v21 }
 0x72b   : > { %4177 = vmatpush3.bf16.msra.mxu0 %v4174_v21 }
 0x72c   : > { %4179 = vmatprep.subr.bf16.mxu0 %v4178_v61 }
 0x72f   : > { %4181 = vmatpush3.bf16.msra.mxu0 %v4178_v61 }
 0x730   : > { %4183 = vmatprep.subr.bf16.mxu0 %v4182_v63 }
 0x733   : > { %4185 = vmatpush3.bf16.msra.mxu0 %v4182_v63 }
 0x734   : > { %4187 = vmatprep.subr.bf16.mxu0 %v4186_v2 }
 0x737   : > { %4189 = vmatpush3.bf16.msra.mxu0 %v4186_v2 }
 0x738   : > { %4191 = vmatprep.subr.bf16.mxu0 %v4190_v5 }
 0x73b   : > { %4193 = vmatpush3.bf16.msra.mxu0 %v4190_v5 }
 0x7f5   : > { %v3975_v7 = vpop.f32.mrb[14].mxu0 }
 0x7f6   : > { %v2996_v10 = vadd.f32 %v4455_v9, %v3975_v7  ;;  %v2984_v11 = vpop.f32.mrb[15].mxu0  ;;  %v3176_v7 = vld [vmem:[#allocation28 + $0x78] sm:$0xff] }
 0x7f7   : > { %v2995_v12 = vadd.f32 %v2984_v11, %v1438_v6  ;;  %v3175_v6 = vld [vmem:[#allocation28 + $0x70] sm:$0xff]  ;;  %v3617_v9 = vld [vmem:[#allocation26] ss:$0 sm:$0xff] }
 0x7f8   : > { %v5760_v13 = vadd.f32 %v3614_v8, %v2996_v10 }
 0x7f9   : > { %v5762_v14 = vadd.f32 %v3614_v8, %v2995_v12  ;;  %v4194_v8 = vpack.c.bf16 %v3176_v7, %v3175_v6 }
 0x7fa   : > { %v3011_v15 = vsel %vm723_vm0, %v5760_v13, 0.0 }
 0x7fb   : > { %3012 = vadd.xlane.f32.xlu1 %v3011_v15  ;;  %v3008_v16 = vsel %vm723_vm0, %v5762_v14, 0.0  ;;  %4195 = vmatprep.subr.bf16.mxu0 %v4194_v8 }
 0x7fc   : > { %3009 = vadd.xlane.f32.xlu0 %v3008_v16  ;;  %4197 = vmatpush3.bf16.msra.mxu0 %v4194_v8 }
 0x888   : > { %v3013_v17 = vpop.xlane.xlu1 %3012 }
 0x889   : > { %v3016_v18 = vmul.f32 0.03125, %v3013_v17  ;;  %v3010_v19 = vpop.xlane.xlu0 %3009 }
 0x88a   : > { %v3015_v20 = vmul.f32 0.03125, %v3010_v19 }
 0x88b   : > { %v3018_v22 = vsub.f32 %v5760_v13, %v3016_v18 }
 0x88c   : > { %v3017_v23 = vsub.f32 %v5762_v14, %v3015_v20 }
 0x88d   : > { %v3020_v24 = vmul.f32 %v3018_v22, %v3018_v22 }
 0x88e   : > { %v3019_v25 = vmul.f32 %v3017_v23, %v3017_v23 }
 0x88f   : > { %v3024_v26 = vsel %vm723_vm0, %v3020_v24, 0.0 }
 0x890   : > { %3025 = vadd.xlane.f32.xlu1 %v3024_v26  ;;  %v3021_v27 = vsel %vm723_vm0, %v3019_v25, 0.0 }
 0x891   : > { %3022 = vadd.xlane.f32.xlu0 %v3021_v27 }
 0x91d   : > { %v3026_v41 = vpop.xlane.xlu1 %3025 }
 0x91e   : > { %v3028_v33 = vmul.f32 0.03125, %v3026_v41  ;;  %v3023_v42 = vpop.xlane.xlu0 %3022 }
 0x91f   : > { %v3027_v43 = vmul.f32 0.03125, %v3023_v42 }
 0x920   : > { %v3030_v44 = vadd.f32 1e-05, %v3028_v33 }
 0x921   : > { %v3029_v45 = vadd.f32 1e-05, %v3027_v43 }
 0x922   : > { %4447 = vrsqrt.f32 %v3030_v44 }
 0x923   : > { %4449 = vrsqrt.f32 %v3029_v45 }
 0x92c   : > { %v4448_v48 = vpop.eup %4447 }
 0x92d   : > { %v4450_v51 = vpop.eup %4449  ;;  %v3034_v52 = vmul.f32 %v4448_v48, %v3018_v22 }
 0x92e   : > { %v3033_v54 = vmul.f32 %v4450_v51, %v3017_v23 }
 0x92f   : > { %v3042_v38 = vmul.f32 %v3615_v50, %v3034_v52 }
 0x930   : > { %v3041_v39 = vmul.f32 %v3615_v50, %v3033_v54 }
 0x931   : > { %v3050_v46 = vadd.f32 %v3616_v55, %v3042_v38 }
 0x932   : > { %v3049_v37 = vadd.f32 %v3616_v55, %v3041_v39 }
 0x934   : > { %3984 = vmatprep.mubr.msk.f32.mxu1 %vm723_vm0, %v3049_v37 }
 0x935   : > { %3985 = vmatmul.mubr.msk.f32.vlgmr.msra.gmra.mrb[26].mxu1 %vm723_vm0, %v3050_v46 }
 0xa08   : > { %v3986_v10 = vpop.f32.mrb[26].mxu1 }
 0xa09   : > { %v3140_v11 = vadd.f32 %v3986_v10, %v3617_v9  ;;  %v3134_v12 = vpop.f32.mrb[27].mxu1 }
 0xa0a   : > { %v3135_v15 = vadd.f32 %v3617_v9, %v3134_v12 }
 0xa0b   : > { %v3146_v16 = vmul.f32 0.044715, %v3140_v11  ;;  %v3144_v34 = vmul.f32 0.5, %v3140_v11 }
 0xa0c   : > { %v3145_v17 = vmul.f32 0.044715, %v3135_v15  ;;  %v3143_v31 = vmul.f32 0.5, %v3135_v15 }
 0xa0d   : > { %v3148_v18 = vmul.f32 %v3146_v16, %v3140_v11 }
 0xa0e   : > { %v3147_v19 = vmul.f32 %v3145_v17, %v3135_v15 }
 0xa0f   : > { %v3150_v20 = vmul.f32 %v3148_v18, %v3140_v11 }
 0xa10   : > { %v3149_v22 = vmul.f32 %v3147_v19, %v3135_v15 }
 0xa11   : > { %v3152_v23 = vadd.f32 %v3150_v20, %v3140_v11 }
 0xa12   : > { %v3151_v24 = vadd.f32 %v3149_v22, %v3135_v15 }
 0xa13   : > { %v3154_v25 = vmul.f32 0.7978846, %v3152_v23 }
 0xa14   : > { %v3153_v26 = vmul.f32 0.7978846, %v3151_v24 }
 0xa15   : > { %4451 = vtanh.f32 %v3154_v25 }
 0xa16   : > { %4453 = vtanh.f32 %v3153_v26 }
 0xa1f   : > { %v4452_v27 = vpop.eup %4451 }
 0xa20   : > { %v4454_v28 = vpop.eup %4453  ;;  %v3158_v30 = vadd.f32 1.0, %v4452_v27 }
 0xa21   : > { %v3157_v32 = vadd.f32 1.0, %v4454_v28 }
 0xa22   : > { %v3160_v29 = vmul.f32 %v3158_v30, %v3144_v34 }
 0xa23   : > { %v3159_v35 = vmul.f32 %v3157_v32, %v3143_v31 }
 0xa25   : > { %4019 = vmatprep.mubr.f32.mxu0 %v3159_v35 }
 0xa26   : > { %4020 = vmatmul.mubr.f32.vlgmr.msra.gmra.mrb[16].mxu0 %v3160_v29 }
 0xaf9   : > { %v4021_v40 = vpop.f32.mrb[16].mxu0 }
 0xafa   : > { %v3256_v41 = vadd.f32 %v4021_v40, %v3620_v36  ;;  %v3250_v33 = vpop.f32.mrb[17].mxu0 }
 0xafb   : > { %v3251_v42 = vadd.f32 %v3620_v36, %v3250_v33 }
 0xafc   : > { %v3260_v43 = vadd.f32 %v3256_v41, %v5760_v13 }
 0xafd   : > { %v3259_v44 = vadd.f32 %v3251_v42, %v5762_v14 }
 0xafe   : > { %3262 = vst.msk [vmem:[%s713_s6 + $0x8] sm:$0xff] %vm723_vm0, %v3260_v43 }
 0xaff   : > { %3261 = vst.msk [vmem:[%s713_s6] sm:$0xff] %vm723_vm0, %v3259_v44 }
 0xb00   : > { %4876 = shalt.err (!%p4873_p8)
}
 0xb01   : > { %s4877_s21 = scalar_lea.hbm %s5781_s16, 256  ;;  %s4881_s3 = scalar_lea.hbm %s5921_s4, 512 }
 0xb02   : > { %p4878_p7 = scmp.ne.s32.totalorder %s5781_s16, %s4877_s21  ;;  %p4882_p11 = scmp.lt.u32.totalorder %s5781_s16, %s5921_s4 }
 0xb03   : > { %p4883_p5 = scmp.lt.u32.totalorder %s4881_s3, %s4877_s21  ;;  %p4885_p4 = scmp.lt.u32.totalorder %s4877_s21, %s5781_s16 }
 0xb04   : > { %p4879_p9 = pnand %p4878_p7, %p5922_p3 }
 0xb05   : > { %p4884_p13 = por %p4883_p5, %p4882_p11 }
 0xb06   : > { %p4880_p6 = pneg %p4879_p9 }
 0xb07   : > { %p4886_p2 = por %p4885_p4, %p4884_p13 }
 0xb09   : > { %p4887_p10 = pnand %p4886_p2, %p4880_p6 }
 0xb0b   : > { %4890 = shalt.err (!%p4887_p10)
}
 0xb0c   : > { %s4997_s8 = smov 128   ;;  %s4998_s15 = smov 8  }
 0xb0d   : > { %4262 = dma.vmem_to_hbm [thread:$0]  (%p5922_p3), %s5783_s7, 256, %s5781_s16, %s3264_s17, %s4997_s8, %s4997_s8, %s4998_s15  }
 0xb0e PF: > { %s5923_s1 = sld [smem:[#allocation42_spill]]  ;;  %p5924_p12 = scmp.ne.s32.totalorder %s5906_s28, 0 }
 0xb0f   : > { %p5925_p0 = scmp.ge.s32.totalorder %s4977_s23, 2 }
 0xb11   : > { %p4312_p1 = pnand %p5925_p0, %p5924_p12 }
 0xb14   : > { %s3294_s24 = sand.u32 1, %s5923_s1  }
 0xb15   : > { %s3295_s30 = scalar_lea.sflag [#allocation8], %s3294_s24 }
 0xb16   : > { %4952 = dma.done.wait (!%p4312_p1), %s3295_s30, 256  }
 0xb17   : > { %4954 = vsyncadd (!%p4312_p1), %s3295_s30, 4294967040  ;;  %s39_s23 = sadd.s32 1, %s4977_s23   ;;  %s5926_s18 = sld [smem:[#allocation43_spill]] }
 0xb18   : > { %p36_p8 = scmp.ge.s32.totalorder %s39_s23, 4   ;;  %s5927_s29 = sld [smem:[#allocation44_spill]] }
 0xb19   : > { %s5928_s0 = smov %s5934_s20  ;;  %s5930_s20 = smov %s5456_s26 }
 0xb1a   : > { %s5931_s21 = smov %s4973_s22  ;;  %s5932_s22 = smov %s5928_s0 }
 0xb1b   :  { %38 = sbr.rel (!%p36_p8) target bundleno = 26 (0x1a), region = 215 }
 0xb1e   : > { %5929 = sst [smem:[#allocation42_spill]] %s5927_s29 }
 0xb22   :  { %3300 = vsyncpa [#allocation7], 1 }
 0xb23   :  { %3302 = vsyncpa [#allocation7 + $0x1], 1 }
 0xb24   :  { %3303 = vsyncpa [#allocation12], 1 }
 0xb25   :  { %3304 = vsyncpa [#allocation15], 1 }
 0xb26   :  { %3305 = vsyncpa [#allocation18], 1 }
 0xb27   :  { %3306 = vsyncpa [#allocation21], 1 }
 0xb28   :  { %3307 = vsyncpa [#allocation24], 1 }
 0xb29   :  { %3308 = vsyncpa [#allocation27], 1 }
 0xb2a   :  { %3309 = vsyncpa [#allocation30], 1 }
 0xb2b   :  { %3310 = vsyncpa [#allocation8], 1 }
 0xb2c   :  { %3312 = vsyncpa [#allocation8 + $0x1], 1 }
 0xb2d   :  { %3313 = vsyncpa [#allocation9], 1 }
 0xb2e   :  { %3315 = vsyncpa [#allocation9 + $0x1], 1 }

</bundles_post_ra>
